<compile_context>
chip_gen: v7x
topology: tpu7x:2x2x1
jax: 0.10.0
libtpu: 0.0.40
codegen_flags: <defaults>
</compile_context>

<pallas_src>
import math
from functools import partial

import jax
import jax.numpy as jnp
from jax.experimental import pallas as pl
from jax.experimental.pallas import tpu as pltpu


def _round_up(x, m):
    return ((x + m - 1) // m) * m


def _tpu_generation():
    """Best-effort TPU generation (5, 6, 7, ...); 0 if unknown."""
    try:
        kind = jax.devices()[0].device_kind.lower()
    except Exception:
        return 0
    for g in (7, 6, 5, 4):
        if f"v{g}" in kind:
            return g
    return 0


def discriminator_kernel(z_ref, w1_ref, b1_ref, w2_ref, b2_ref, w3_ref, b3_ref,
                         out_ref, *, act_dtype):
    # z arrives as f32; cast to bf16 in-kernel (a handful of VPU pack ops on a
    # small (tb, latent_dim) tile — avoids a separate wrapper-side HBM pass).
    z = z_ref[...].astype(jnp.bfloat16)

    # Layer 1: Linear(latent_dim, 512). bf16 x bf16 -> f32 on the MXU.
    h1 = jnp.dot(z, w1_ref[...], preferred_element_type=jnp.float32) + b1_ref[...]
    h1 = h1.astype(act_dtype)
    h1 = jnp.maximum(h1, 0.2 * h1)                      # LeakyReLU(0.2)

    # Layer 2: Linear(512, 256). bf16 x bf16 -> f32 on the MXU.
    h2 = jnp.dot(h1.astype(jnp.bfloat16), w2_ref[...],
                 preferred_element_type=jnp.float32) + b2_ref[...]
    h2 = h2.astype(act_dtype)
    h2 = jnp.maximum(h2, 0.2 * h2)                      # LeakyReLU(0.2)

    # Layer 3: Linear(256, 1) as a VPU multiply + lane (XLU) reduction; keeps
    # the near-empty N=1 result off the MXU.  Product promotes to f32.
    h3 = jnp.sum(h2 * w3_ref[...], axis=-1, keepdims=True) + b3_ref[...]
    out_ref[...] = jax.nn.sigmoid(h3)


def _choose_tile(batch, gen, block_b):
    # Per-generation cap keeps intermediates + double-buffered z/out tiles under
    # the scoped-VMEM default (v5e: 16 MiB, v6e/v7x: 32 MiB) at f32/bf16 acts.
    cap = {5: 2048, 6: 4096, 7: 4096}.get(gen, 2048)
    tb = min(block_b, cap, _round_up(max(batch, 1), 128))
    tb = max(128, (tb // 128) * 128)
    if gen == 7:
        # Make sure the "parallel" batch axis has >=2 grid steps when the batch
        # is large enough, so both v7x TensorCores get work.
        tb = min(tb, max(128, _round_up(-(-batch // 2), 128)))
    return tb


def discriminator_forward(z, params, *, block_b=4096):
    """z: (B, latent_dim) float32. Returns (B, 1) float32 validity scores."""
    B, latent_dim = z.shape
    gen = _tpu_generation()

    # bf16 activations only where the VPU has a bf16 path (v6e / v7x).
    act_dtype = jnp.bfloat16 if gen in (6, 7) else jnp.float32

    tb = _choose_tile(B, gen, block_b)
    b_pad = _round_up(B, tb)
    if b_pad != B:
        # TODO(synk): padded rows are computed and sliced off; could instead use
        # a partial last tile, but the pad is a no-op at training batch sizes.
        z = jnp.pad(z, ((0, b_pad - B), (0, 0)))

    grid = (b_pad // tb,)

    # Explicit scoped-VMEM budget with headroom, kept well below physical VMEM
    # on every generation (v7x physical = 64 MiB).
    vmem_limit = {5: 32 << 20, 6: 64 << 20, 7: 48 << 20}.get(gen, None)
    compiler_params = pltpu.CompilerParams(
        dimension_semantics=("parallel",),
        vmem_limit_bytes=vmem_limit)

    out = pl.pallas_call(
        partial(discriminator_kernel, act_dtype=act_dtype),
        out_shape=jax.ShapeDtypeStruct((b_pad, 1), jnp.float32),
        grid=grid,
        in_specs=[
            pl.BlockSpec((tb, latent_dim), lambda i: (i, 0)),   # z tile (f32)
            pl.BlockSpec((latent_dim, 512), lambda i: (0, 0)),  # w1 (VMEM-resident)
            pl.BlockSpec((1, 512), lambda i: (0, 0)),           # b1
            pl.BlockSpec((512, 256), lambda i: (0, 0)),         # w2 (VMEM-resident)
            pl.BlockSpec((1, 256), lambda i: (0, 0)),           # b2
            pl.BlockSpec((1, 256), lambda i: (0, 0)),           # w3 row
            pl.BlockSpec((1, 1), lambda i: (0, 0)),             # b3
        ],
        out_specs=pl.BlockSpec((tb, 1), lambda i: (i, 0)),
        compiler_params=compiler_params,
    )(z, params["w1"], params["b1"], params["w2"], params["b2"],
      params["w3"], params["b3"])

    return out[:B]


def init_linear(key, in_features, out_features, *, w_dtype=jnp.float32,
                transpose=True):
    """PyTorch-style nn.Linear init: U(-1/sqrt(fan_in), 1/sqrt(fan_in))."""
    kw, kb = jax.random.split(key)
    bound = 1.0 / math.sqrt(in_features)
    shape = (in_features, out_features) if transpose else (out_features, in_features)
    w = jax.random.uniform(kw, shape, jnp.float32, -bound, bound).astype(w_dtype)
    b = jax.random.uniform(kb, (1, out_features), jnp.float32, -bound, bound)
    return w, b


def init_params(key, latent_dim):
    k1, k2, k3 = jax.random.split(key, 3)
    # MXU layers: weights stored (in, out) in bf16.  Note: bf16 weights mean no
    # bit-parity with an f32 PyTorch Discriminator; use f32 if parity required.
    w1, b1 = init_linear(k1, latent_dim, 512, w_dtype=jnp.bfloat16)
    w2, b2 = init_linear(k2, 512, 256, w_dtype=jnp.bfloat16)
    # Final layer kept as a (1, 256) f32 row for the VPU reduction.
    w3, b3 = init_linear(k3, 256, 1, w_dtype=jnp.float32, transpose=False)
    return {"w1": w1, "b1": b1, "w2": w2, "b2": b2, "w3": w3, "b3": b3}


def reference_forward(z, params, *, act_dtype):
    """Plain-JAX reference mirroring the kernel's bf16/f32 math exactly."""
    zb = z.astype(jnp.bfloat16)
    h1 = jnp.dot(zb, params["w1"],
                 preferred_element_type=jnp.float32) + params["b1"]
    h1 = h1.astype(act_dtype)
    h1 = jnp.maximum(h1, 0.2 * h1)
    h2 = jnp.dot(h1.astype(jnp.bfloat16), params["w2"],
                 preferred_element_type=jnp.float32) + params["b2"]
    h2 = h2.astype(act_dtype)
    h2 = jnp.maximum(h2, 0.2 * h2)
    h3 = jnp.sum(h2 * params["w3"], axis=-1, keepdims=True) + params["b3"]
    return jax.nn.sigmoid(h3)


if __name__ == "__main__":
    latent_dim = 32
    batch = 8

    key = jax.random.PRNGKey(0)
    kz, kp = jax.random.split(key)
    z = jax.random.normal(kz, (batch, latent_dim), dtype=jnp.float32)
    params = init_params(kp, latent_dim)

    validity = discriminator_forward(z, params)
    validity = jax.block_until_ready(validity)

    gen = _tpu_generation()
    act_dtype = jnp.bfloat16 if gen in (6, 7) else jnp.float32
    ref = reference_forward(z, params, act_dtype=act_dtype)

    assert validity.shape == (batch, 1), validity.shape
    assert jnp.allclose(validity, ref, atol=2e-3, rtol=2e-3), (
        "Pallas output mismatch vs JAX reference")

    print("KERNEL_OK")
</pallas_src>

<mosaic_0001>
module attributes {stable_mosaic.version = 11 : i64} {
  func.func @discriminator_kernel(%arg0: i32, %arg1: memref<128x32xf32, #tpu.memory_space<vmem>>, %arg2: memref<32x512xbf16, #tpu.memory_space<vmem>>, %arg3: memref<1x512xf32, #tpu.memory_space<vmem>>, %arg4: memref<512x256xbf16, #tpu.memory_space<vmem>>, %arg5: memref<1x256xf32, #tpu.memory_space<vmem>>, %arg6: memref<1x256xf32, #tpu.memory_space<vmem>>, %arg7: memref<1x1xf32, #tpu.memory_space<vmem>>, %arg8: memref<128x1xf32, #tpu.memory_space<vmem>>) attributes {dimension_semantics = [#tpu.dimension_semantics<parallel>], iteration_bounds = array<i64: 1>, scalar_prefetch = 0 : i64, scratch_operands = 0 : i64, tpu.core_type = #tpu.core_type<tc>, window_params = [{transform_indices = @transform_0, window_bounds = array<i64: 128, 32>}, {pipeline_mode = #tpu.pipeline_mode<synchronous>, transform_indices = @transform_1, window_bounds = array<i64: 32, 512>}, {pipeline_mode = #tpu.pipeline_mode<synchronous>, transform_indices = @transform_2, window_bounds = array<i64: 1, 512>}, {pipeline_mode = #tpu.pipeline_mode<synchronous>, transform_indices = @transform_3, window_bounds = array<i64: 512, 256>}, {pipeline_mode = #tpu.pipeline_mode<synchronous>, transform_indices = @transform_4, window_bounds = array<i64: 1, 256>}, {pipeline_mode = #tpu.pipeline_mode<synchronous>, transform_indices = @transform_5, window_bounds = array<i64: 1, 256>}, {pipeline_mode = #tpu.pipeline_mode<synchronous>, transform_indices = @transform_6, window_bounds = array<i64: 1, 1>}, {transform_indices = @transform_7, window_bounds = array<i64: 128, 1>}]} {
    %c0 = arith.constant 0 : index
    %c0_0 = arith.constant 0 : index
    %0 = vector.load %arg1[%c0, %c0_0] : memref<128x32xf32, #tpu.memory_space<vmem>>, vector<128x32xf32>
    %1 = arith.truncf %0 : vector<128x32xf32> to vector<128x32xbf16>
    %c0_1 = arith.constant 0 : index
    %c0_2 = arith.constant 0 : index
    %2 = vector.load %arg2[%c0_1, %c0_2] : memref<32x512xbf16, #tpu.memory_space<vmem>>, vector<32x512xbf16>
    %cst = arith.constant dense<0.000000e+00> : vector<128x512xf32>
    %3 = tpu.matmul %1, %2, %cst {dimension_numbers = #tpu.dot_dimension_numbers<[1], [0], [0], [1], [0, 0, 1, 1], [], []>} : vector<128x32xbf16>, vector<32x512xbf16>, vector<128x512xf32> -> vector<128x512xf32>
    %c0_3 = arith.constant 0 : index
    %c0_4 = arith.constant 0 : index
    %4 = vector.load %arg3[%c0_3, %c0_4] : memref<1x512xf32, #tpu.memory_space<vmem>>, vector<1x512xf32>
    %5 = vector.broadcast %4 : vector<1x512xf32> to vector<128x512xf32>
    %6 = arith.addf %3, %5 : vector<128x512xf32>
    %cst_5 = arith.constant 2.000000e-01 : f32
    %7 = vector.broadcast %cst_5 : f32 to vector<128x512xf32>
    %8 = arith.mulf %7, %6 : vector<128x512xf32>
    %9 = arith.maximumf %6, %8 : vector<128x512xf32>
    %10 = arith.truncf %9 : vector<128x512xf32> to vector<128x512xbf16>
    %c0_6 = arith.constant 0 : index
    %c0_7 = arith.constant 0 : index
    %11 = vector.load %arg4[%c0_6, %c0_7] : memref<512x256xbf16, #tpu.memory_space<vmem>>, vector<512x256xbf16>
    %cst_8 = arith.constant dense<0.000000e+00> : vector<128x256xf32>
    %12 = tpu.matmul %10, %11, %cst_8 {dimension_numbers = #tpu.dot_dimension_numbers<[1], [0], [0], [1], [0, 0, 1, 1], [], []>} : vector<128x512xbf16>, vector<512x256xbf16>, vector<128x256xf32> -> vector<128x256xf32>
    %c0_9 = arith.constant 0 : index
    %c0_10 = arith.constant 0 : index
    %13 = vector.load %arg5[%c0_9, %c0_10] : memref<1x256xf32, #tpu.memory_space<vmem>>, vector<1x256xf32>
    %14 = vector.broadcast %13 : vector<1x256xf32> to vector<128x256xf32>
    %15 = arith.addf %12, %14 : vector<128x256xf32>
    %cst_11 = arith.constant 2.000000e-01 : f32
    %16 = vector.broadcast %cst_11 : f32 to vector<128x256xf32>
    %17 = arith.mulf %16, %15 : vector<128x256xf32>
    %18 = arith.maximumf %15, %17 : vector<128x256xf32>
    %c0_12 = arith.constant 0 : index
    %c0_13 = arith.constant 0 : index
    %19 = vector.load %arg6[%c0_12, %c0_13] : memref<1x256xf32, #tpu.memory_space<vmem>>, vector<1x256xf32>
    %20 = vector.broadcast %19 : vector<1x256xf32> to vector<128x256xf32>
    %21 = arith.mulf %18, %20 : vector<128x256xf32>
    %cst_14 = arith.constant dense<0.000000e+00> : vector<128xf32>
    %22 = vector.multi_reduction <add>, %21, %cst_14 [1] : vector<128x256xf32> to vector<128xf32>
    %23 = vector.shape_cast %22 : vector<128xf32> to vector<128x1xf32>
    %c0_15 = arith.constant 0 : index
    %c0_16 = arith.constant 0 : index
    %24 = vector.load %arg7[%c0_15, %c0_16] : memref<1x1xf32, #tpu.memory_space<vmem>>, vector<1x1xf32>
    %25 = vector.broadcast %24 : vector<1x1xf32> to vector<128x1xf32>
    %26 = arith.addf %23, %25 : vector<128x1xf32>
    %27 = arith.negf %26 : vector<128x1xf32>
    %28 = math.exp %27 : vector<128x1xf32>
    %cst_17 = arith.constant 1.000000e+00 : f32
    %29 = vector.broadcast %cst_17 : f32 to vector<128x1xf32>
    %30 = arith.addf %29, %28 : vector<128x1xf32>
    %31 = arith.divf %29, %30 : vector<128x1xf32>
    %c0_18 = arith.constant 0 : index
    %c0_19 = arith.constant 0 : index
    %32 = vector.load %arg8[%c0_18, %c0_19] : memref<128x1xf32, #tpu.memory_space<vmem>>, vector<128x1xf32>
    tpu.vector_store %arg8[%c0_18, %c0_19], %31 {strides = array<i32>} : memref<128x1xf32, #tpu.memory_space<vmem>>, vector<128x1xf32>,
    return
  }
  func.func @transform_0(%arg0: i32) -> (i32, i32) {
    %c0_i32 = arith.constant 0 : i32
    %c0_i32_0 = arith.constant 0 : i32
    return %arg0, %c0_i32 : i32, i32
  }
  func.func @transform_1(%arg0: i32) -> (i32, i32) {
    %c0_i32 = arith.constant 0 : i32
    %c0_i32_0 = arith.constant 0 : i32
    %c0_i32_1 = arith.constant 0 : i32
    return %c0_i32, %c0_i32_0 : i32, i32
  }
  func.func @transform_2(%arg0: i32) -> (i32, i32) {
    %c0_i32 = arith.constant 0 : i32
    %c0_i32_0 = arith.constant 0 : i32
    %c0_i32_1 = arith.constant 0 : i32
    return %c0_i32, %c0_i32_0 : i32, i32
  }
  func.func @transform_3(%arg0: i32) -> (i32, i32) {
    %c0_i32 = arith.constant 0 : i32
    %c0_i32_0 = arith.constant 0 : i32
    %c0_i32_1 = arith.constant 0 : i32
    return %c0_i32, %c0_i32_0 : i32, i32
  }
  func.func @transform_4(%arg0: i32) -> (i32, i32) {
    %c0_i32 = arith.constant 0 : i32
    %c0_i32_0 = arith.constant 0 : i32
    %c0_i32_1 = arith.constant 0 : i32
    return %c0_i32, %c0_i32_0 : i32, i32
  }
  func.func @transform_5(%arg0: i32) -> (i32, i32) {
    %c0_i32 = arith.constant 0 : i32
    %c0_i32_0 = arith.constant 0 : i32
    %c0_i32_1 = arith.constant 0 : i32
    return %c0_i32, %c0_i32_0 : i32, i32
  }
  func.func @transform_6(%arg0: i32) -> (i32, i32) {
    %c0_i32 = arith.constant 0 : i32
    %c0_i32_0 = arith.constant 0 : i32
    %c0_i32_1 = arith.constant 0 : i32
    return %c0_i32, %c0_i32_0 : i32, i32
  }
  func.func @transform_7(%arg0: i32) -> (i32, i32) {
    %c0_i32 = arith.constant 0 : i32
    %c0_i32_0 = arith.constant 0 : i32
    return %arg0, %c0_i32 : i32, i32
  }
}

</mosaic_0001>

<bundles_post_ra>
// kernel: tpu_custom_call.1
= control target key start
LH: loop header
LB: loop body
LE: loop exit
PB: predicated region body
PF: predicated region fallthrough
CT: control target
= control target key end

     0   :  { %s2244_s0 = inlined_call_operand.vmem [shape: f32[128,32], index: 0, kind: input, shape index: {}]   ;;  %s2245_s1 = inlined_call_operand.vmem [shape: bf16[32,512], index: 1, kind: input, shape index: {}]   ;;  %s2246_s2 = inlined_call_operand.vmem [shape: f32[1,512], index: 2, kind: input, shape index: {}]   ;;  %s2247_s3 = inlined_call_operand.hbm [shape: bf16[512,256], index: 3, kind: input, shape index: {}]   ;;  %s2248_s4 = inlined_call_operand.vmem [shape: f32[1,256], index: 4, kind: input, shape index: {}]   ;;  %s2249_s5 = inlined_call_operand.vmem [shape: f32[1,256], index: 5, kind: input, shape index: {}]   ;;  %s2250_s6 = inlined_call_operand.<no memory space> [shape: f32[1,1], index: 6, kind: input, shape index: {}]   ;;  %s2251_s7 = inlined_call_operand.vmem [shape: f32[128,1], index: 7, kind: output, shape index: {}]  }
   0x1   :  { %v12_v0 = vstv %s2250_s6 }
   0x2   :  { %13 = vst [vmem:[#allocation2] sm:$0x1] %v12_v0 }
   0x3   :  { %14 = vsyncpa [#allocation4], 0  ;;  %s1836_s26 = smov [#allocation3]   ;;  %s1812_s30 = scalar_lea.hbm %s2247_s3, 8192 }
   0x4   :  { %s26_s27 = sshll.u32 %s1836_s26, 4  ;;  %p1813_p0 = scmp.ne.s32.totalorder %s2247_s3, %s1812_s30  ;;  %s27_s27 = int_to_ptr.vmem [resolvable:$true] %s26_s27 }
   0x5   :  { %p1816_p1 = scmp.lt.u32.totalorder %s1812_s30, %s2247_s3 }
   0x7   :  { %p1818_p2 = pnand %p1816_p1, %p1813_p0 }
   0x9   :  { %1821 = shalt.err (!%p1818_p2)
}
   0xa   :  { %s1822_s6 = scalar_lea.vmem %s27_s27, 8192  ;;  %p1827_p4 = scmp.lt.s32.totalorder %s27_s27, %s27_s27 }
   0xb   :  { %p1823_p3 = scmp.ne.s32.totalorder %s27_s27, %s1822_s6  ;;  %p1828_p5 = scmp.lt.s32.totalorder %s1822_s6, %s1822_s6 }
   0xd   :  { %p1829_p6 = por %p1828_p5, %p1827_p4 }
   0xf   :  { %p1830_p7 = pnand %p1829_p6, %p1823_p3 }
  0x11   :  { %1833 = shalt.err (!%p1830_p7)
}
  0x12   :  { %s1837_s12 = smov 128   ;;  %s1838_s13 = smov 8  }
  0x13   :  { %32 = dma.hbm_to_vmem [thread:$0]  %s2247_s3, 8192, %s27_s27, [#allocation4], %s1837_s12, %s1837_s12, %s1838_s13  }
  0x14   :  { %1834 = dma.done.wait [#allocation4], 8192  }
  0x15   :  { %1835 = vsyncadd [#allocation4], 4294959104  ;;  %v1839_v1 = vmov 0   ;;  %v1640_v2 = vld [vmem:[%s2245_s1 + $0x4] ss:$16 sps:$4 sm:$0xff]   ;;  %v44_v11 = vld [vmem:[%s2244_s0 + $0x8] sm:$0xff] }
  0x16   :  { %194 = vmatprep.mubr.bf16.mxu0 %v1839_v1  ;;  %307 = vmatprep.mubr.bf16.mxu1 %v1839_v1  ;;  %v1642_v3 = vld [vmem:[%s2245_s1 + $0xc] ss:$16 sps:$4 sm:$0xff]   ;;  %v1644_v4 = vld [vmem:[%s2245_s1] ss:$16 sps:$4 sm:$0xff]   ;;  %v1645_v5 = vld [vmem:[%s2245_s1 + $0x8] ss:$16 sps:$4 sm:$0xff]  }
  0x17   :  { %162 = vmatprep.subr.bf16.mxu0 %v1640_v2  ;;  %275 = vmatprep.subr.bf16.mxu1 %v1642_v3  ;;  %v1646_v6 = vld [vmem:[%s2245_s1 + $0x24] ss:$16 sps:$4 sm:$0xff]   ;;  %v1648_v7 = vld [vmem:[%s2245_s1 + $0x2c] ss:$16 sps:$4 sm:$0xff]   ;;  %v1650_v8 = vld [vmem:[%s2245_s1 + $0x20] ss:$16 sps:$4 sm:$0xff]  }
  0x18   :  { %163 = vmatpush1.bf16.msra.mxu0 %v1644_v4  ;;  %276 = vmatpush1.bf16.msra.mxu1 %v1645_v5  ;;  %v1651_v9 = vld [vmem:[%s2245_s1 + $0x28] ss:$16 sps:$4 sm:$0xff]   ;;  %v43_v10 = vld [vmem:[%s2244_s0] sm:$0xff]  ;;  %vm137_vm0 = vcmask 261120   ;;  %v45_v13 = vld [vmem:[%s2244_s0 + $0x10] sm:$0xff]  ;;  %vm1445_vm1 = vcmask 7168  }
  0x19   :  { %164 = vmatprep.subr.bf16.mxu0 %v1646_v6  ;;  %277 = vmatprep.subr.bf16.mxu1 %v1648_v7  ;;  %v59_v12 = vpack.c.bf16 %v44_v11, %v43_v10  ;;  %v46_v14 = vld [vmem:[%s2244_s0 + $0x18] sm:$0xff]  ;;  %v1652_v15 = vld [vmem:[#allocation3] ss:$8 sps:$4 sm:$0xff]   ;;  %v1654_v16 = vld [vmem:[#allocation3 + $0x4] ss:$8 sps:$4 sm:$0xff]  }
  0x1a   :  { %v1655_v17 = vld [vmem:[#allocation3 + $0x100] ss:$8 sps:$4 sm:$0xff]   ;;  %v1657_v18 = vld [vmem:[#allocation3 + $0x104] ss:$8 sps:$4 sm:$0xff]   ;;  %v1658_v19 = vld [vmem:[#allocation3 + $0x10] ss:$8 sps:$4 sm:$0xff]   ;;  %v60_v21 = vpack.c.bf16 %v46_v14, %v45_v13 }
  0x1b   :  { %v1660_v20 = vld [vmem:[#allocation3 + $0x14] ss:$8 sps:$4 sm:$0xff]   ;;  %v1661_v23 = vld [vmem:[#allocation3 + $0x110] ss:$8 sps:$4 sm:$0xff]   ;;  %v1666_v24 = vld [vmem:[#allocation3 + $0x24] ss:$8 sps:$4 sm:$0xff]  }
  0x1c   :  { %165 = vmatpush1.bf16.msra.mxu0 %v1650_v8  ;;  %278 = vmatpush1.bf16.msra.mxu1 %v1651_v9  ;;  %v1663_v22 = vld [vmem:[#allocation3 + $0x114] ss:$8 sps:$4 sm:$0xff]   ;;  %v1664_v25 = vld [vmem:[#allocation3 + $0x20] ss:$8 sps:$4 sm:$0xff]   ;;  %v1669_v26 = vld [vmem:[#allocation3 + $0x124] ss:$8 sps:$4 sm:$0xff]  }
  0x1d   :  { %944 = vmatprep.subr.bf16.mxu1 %v1654_v16  ;;  %1057 = vmatprep.subr.bf16.mxu0 %v1657_v18  ;;  %v47_v27 = vld [vmem:[%s2244_s0 + $0x20] sm:$0xff]  ;;  %v48_v29 = vld [vmem:[%s2244_s0 + $0x28] sm:$0xff]  ;;  %v1670_v31 = vld [vmem:[#allocation3 + $0x30] ss:$8 sps:$4 sm:$0xff]  }
  0x1e   :  { %v1672_v28 = vld [vmem:[#allocation3 + $0x34] ss:$8 sps:$4 sm:$0xff]   ;;  %v1667_v30 = vld [vmem:[#allocation3 + $0x120] ss:$8 sps:$4 sm:$0xff]   ;;  %v61_v33 = vpack.c.bf16 %v48_v29, %v47_v27  ;;  %v1673_v34 = vld [vmem:[#allocation3 + $0x130] ss:$8 sps:$4 sm:$0xff]  }
  0x1f   :  { %1475 = vmatmul.mubr.msk.bf16.vlgmr.msra.gmra.mrb[0].mxu0 %vm137_vm0, %v59_v12  ;;  %1483 = vmatmul.mubr.msk.bf16.vlgmr.msra.gmra.mrb[0].mxu1 %vm137_vm0, %v59_v12  ;;  %v1675_v32 = vld [vmem:[#allocation3 + $0x134] ss:$8 sps:$4 sm:$0xff]   ;;  %v1678_v35 = vld [vmem:[#allocation3 + $0x44] ss:$8 sps:$4 sm:$0xff]   ;;  %v1676_v36 = vld [vmem:[#allocation3 + $0x40] ss:$8 sps:$4 sm:$0xff]  }
  0x20   :  { %204 = vmatprep.mubr.bf16.mxu0 %v1839_v1  ;;  %317 = vmatprep.mubr.bf16.mxu1 %v1839_v1  ;;  %v1681_v37 = vld [vmem:[#allocation3 + $0x144] ss:$8 sps:$4 sm:$0xff]   ;;  %v1684_v39 = vld [vmem:[#allocation3 + $0x54] ss:$8 sps:$4 sm:$0xff]   ;;  %v1679_v41 = vld [vmem:[#allocation3 + $0x140] ss:$8 sps:$4 sm:$0xff]  }
  0x21   :  { %945 = vmatpush1.bf16.msra.mxu1 %v1652_v15  ;;  %1058 = vmatpush1.bf16.msra.mxu0 %v1655_v17  ;;  %v49_v38 = vld [vmem:[%s2244_s0 + $0x30] sm:$0xff]  ;;  %v50_v40 = vld [vmem:[%s2244_s0 + $0x38] sm:$0xff]  ;;  %v1688_v47 = vld [vmem:[#allocation3 + $0x60] ss:$8 sps:$4 sm:$0xff]  }
  0x22   :  { %946 = vmatprep.subr.bf16.mxu1 %v1660_v20  ;;  %1059 = vmatprep.subr.bf16.mxu0 %v1663_v22  ;;  %v1682_v42 = vld [vmem:[#allocation3 + $0x50] ss:$8 sps:$4 sm:$0xff]   ;;  %v1687_v43 = vld [vmem:[#allocation3 + $0x154] ss:$8 sps:$4 sm:$0xff]   ;;  %v62_v44 = vpack.c.bf16 %v50_v40, %v49_v38  ;;  %v1690_v46 = vld [vmem:[#allocation3 + $0x64] ss:$8 sps:$4 sm:$0xff]  }
  0x23   :  { %v1685_v45 = vld [vmem:[#allocation3 + $0x150] ss:$8 sps:$4 sm:$0xff]   ;;  %v1693_v48 = vld [vmem:[#allocation3 + $0x164] ss:$8 sps:$4 sm:$0xff]   ;;  %v1696_v50 = vld [vmem:[#allocation3 + $0x74] ss:$8 sps:$4 sm:$0xff]  }
  0x24   :  { %v51_v49 = vld [vmem:[%s2244_s0 + $0x40] sm:$0xff]  ;;  %v52_v51 = vld [vmem:[%s2244_s0 + $0x48] sm:$0xff]  ;;  %v1694_v53 = vld [vmem:[#allocation3 + $0x70] ss:$8 sps:$4 sm:$0xff]  }
  0x25   :  { %947 = vmatpush1.bf16.msra.mxu1 %v1658_v19  ;;  %1060 = vmatpush1.bf16.msra.mxu0 %v1661_v23  ;;  %v1691_v52 = vld [vmem:[#allocation3 + $0x160] ss:$8 sps:$4 sm:$0xff]   ;;  %v1699_v54 = vld [vmem:[#allocation3 + $0x174] ss:$8 sps:$4 sm:$0xff]   ;;  %v63_v55 = vpack.c.bf16 %v52_v51, %v51_v49  ;;  %v1697_v56 = vld [vmem:[#allocation3 + $0x170] ss:$8 sps:$4 sm:$0xff]  }
  0x26   :  { %948 = vmatprep.subr.bf16.mxu1 %v1666_v24  ;;  %1061 = vmatprep.subr.bf16.mxu0 %v1669_v26  ;;  %v1702_v57 = vld [vmem:[#allocation3 + $0x84] ss:$8 sps:$4 sm:$0xff]   ;;  %v1700_v59 = vld [vmem:[#allocation3 + $0x80] ss:$8 sps:$4 sm:$0xff]   ;;  %v54_v61 = vld [vmem:[%s2244_s0 + $0x58] sm:$0xff] }
  0x27   :  { %1476 = vmatmul.mubr.msk.bf16.gmra.mrb[4].mxu0 %vm137_vm0, %v60_v21  ;;  %1484 = vmatmul.mubr.msk.bf16.gmra.mrb[4].mxu1 %vm137_vm0, %v60_v21  ;;  %v53_v58 = vld [vmem:[%s2244_s0 + $0x50] sm:$0xff]  ;;  %v1703_v63 = vld [vmem:[#allocation3 + $0x180] ss:$8 sps:$4 sm:$0xff]   ;;  %v58_v20 = vld [vmem:[%s2244_s0 + $0x78] sm:$0xff] }
  0x28   :  { %214 = vmatprep.mubr.bf16.mxu0 %v1839_v1  ;;  %327 = vmatprep.mubr.bf16.mxu1 %v1839_v1  ;;  %v1705_v60 = vld [vmem:[#allocation3 + $0x184] ss:$8 sps:$4 sm:$0xff]   ;;  %v1708_v62 = vld [vmem:[#allocation3 + $0x94] ss:$8 sps:$4 sm:$0xff]   ;;  %v1706_v0 = vld [vmem:[#allocation3 + $0x90] ss:$8 sps:$4 sm:$0xff]   ;;  %v64_v3 = vpack.c.bf16 %v54_v61, %v53_v58 }
  0x29   :  { %949 = vmatpush1.bf16.msra.mxu1 %v1664_v25  ;;  %1062 = vmatpush1.bf16.msra.mxu0 %v1667_v30  ;;  %v1711_v2 = vld [vmem:[#allocation3 + $0x194] ss:$8 sps:$4 sm:$0xff]   ;;  %v1709_v4 = vld [vmem:[#allocation3 + $0x190] ss:$8 sps:$4 sm:$0xff]   ;;  %v1714_v5 = vld [vmem:[#allocation3 + $0xa4] ss:$8 sps:$4 sm:$0xff]  }
  0x2a   :  { %950 = vmatprep.subr.bf16.mxu1 %v1672_v28  ;;  %1063 = vmatprep.subr.bf16.mxu0 %v1675_v32  ;;  %v1712_v6 = vld [vmem:[#allocation3 + $0xa0] ss:$8 sps:$4 sm:$0xff]   ;;  %v1717_v7 = vld [vmem:[#allocation3 + $0x1a4] ss:$8 sps:$4 sm:$0xff]   ;;  %v1720_v8 = vld [vmem:[#allocation3 + $0xb4] ss:$8 sps:$4 sm:$0xff]  }
  0x2b   :  { %v55_v9 = vld [vmem:[%s2244_s0 + $0x60] sm:$0xff]  ;;  %v56_v10 = vld [vmem:[%s2244_s0 + $0x68] sm:$0xff]  ;;  %v1718_v12 = vld [vmem:[#allocation3 + $0xb0] ss:$8 sps:$4 sm:$0xff]  }
  0x2c   :  { %v1715_v11 = vld [vmem:[#allocation3 + $0x1a0] ss:$8 sps:$4 sm:$0xff]   ;;  %v1723_v13 = vld [vmem:[#allocation3 + $0x1b4] ss:$8 sps:$4 sm:$0xff]   ;;  %v65_v14 = vpack.c.bf16 %v56_v10, %v55_v9  ;;  %v1721_v15 = vld [vmem:[#allocation3 + $0x1b0] ss:$8 sps:$4 sm:$0xff]  }
  0x2d   :  { %951 = vmatpush1.bf16.msra.mxu1 %v1670_v31  ;;  %1064 = vmatpush1.bf16.msra.mxu0 %v1673_v34  ;;  %v1726_v16 = vld [vmem:[#allocation3 + $0xc4] ss:$8 sps:$4 sm:$0xff]   ;;  %v1724_v17 = vld [vmem:[#allocation3 + $0xc0] ss:$8 sps:$4 sm:$0xff]   ;;  %v1735_v23 = vld [vmem:[#allocation3 + $0x1d4] ss:$8 sps:$4 sm:$0xff]   ;;  %v77_v34 = vlaneseq }
  0x2e   :  { %952 = vmatprep.subr.bf16.mxu1 %v1678_v35  ;;  %1065 = vmatprep.subr.bf16.mxu0 %v1681_v37  ;;  %v1729_v18 = vld [vmem:[#allocation3 + $0x1c4] ss:$8 sps:$4 sm:$0xff]   ;;  %v1727_v21 = vld [vmem:[#allocation3 + $0x1c0] ss:$8 sps:$4 sm:$0xff]   ;;  %v1730_v24 = vld [vmem:[#allocation3 + $0xd0] ss:$8 sps:$4 sm:$0xff]  }
  0x2f   :  { %1477 = vmatmul.mubr.msk.bf16.gmra.mrb[8].mxu0 %vm137_vm0, %v61_v33  ;;  %1485 = vmatmul.mubr.msk.bf16.gmra.mrb[8].mxu1 %vm137_vm0, %v61_v33  ;;  %v57_v19 = vld [vmem:[%s2244_s0 + $0x70] sm:$0xff]  ;;  %v1736_v28 = vld [vmem:[#allocation3 + $0xe0] ss:$8 sps:$4 sm:$0xff]   ;;  %v78_v35 = vshrl.u32 %v77_v34, 7 }
  0x30   :  { %224 = vmatprep.mubr.bf16.mxu0 %v1839_v1  ;;  %337 = vmatprep.mubr.bf16.mxu1 %v1839_v1  ;;  %v66_v22 = vpack.c.bf16 %v58_v20, %v57_v19  ;;  %v1733_v25 = vld [vmem:[#allocation3 + $0x1d0] ss:$8 sps:$4 sm:$0xff]   ;;  %v1738_v26 = vld [vmem:[#allocation3 + $0xe4] ss:$8 sps:$4 sm:$0xff]   ;;  %v1739_v29 = vld [vmem:[#allocation3 + $0x1e0] ss:$8 sps:$4 sm:$0xff]  }
  0x31   :  { %953 = vmatpush1.bf16.msra.mxu1 %v1676_v36  ;;  %1066 = vmatpush1.bf16.msra.mxu0 %v1679_v41  ;;  %v1741_v27 = vld [vmem:[#allocation3 + $0x1e4] ss:$8 sps:$4 sm:$0xff]   ;;  %v1744_v30 = vld [vmem:[#allocation3 + $0xf4] ss:$8 sps:$4 sm:$0xff]   ;;  %v1742_v32 = vld [vmem:[#allocation3 + $0xf0] ss:$8 sps:$4 sm:$0xff]  }
  0x32   :  { %954 = vmatprep.subr.bf16.mxu1 %v1684_v39  ;;  %1067 = vmatprep.subr.bf16.mxu0 %v1687_v43  ;;  %v1747_v31 = vld [vmem:[#allocation3 + $0x1f4] ss:$8 sps:$4 sm:$0xff]   ;;  %v1745_v33 = vld [vmem:[#allocation3 + $0x1f0] ss:$8 sps:$4 sm:$0xff]   ;;  %v1999_v36 = vsub.s32 0, %v78_v35  ;;  %v87_v37 = vsub.s32 2, %v78_v35 }
  0x33   :  { %v75_v38 = vld [vmem:[%s2246_s2] sm:$0xf]  ;;  %v2004_v39 = vsub.s32 1, %v78_v35  ;;  %v91_v40 = vsub.s32 3, %v78_v35 }
  0x34   :  { %v2007_v41 = vrot.slane %v75_v38, %v1999_v36 }
  0x35   :  { %955 = vmatpush1.bf16.msra.mxu1 %v1682_v42  ;;  %1068 = vmatpush1.bf16.msra.mxu0 %v1685_v45  ;;  %v2009_v42 = vrot.slane %v75_v38, %v87_v37  ;;  %v2012_v43 = vrot.slane %v75_v38, %v2004_v39 }
  0x36   :  { %956 = vmatprep.subr.bf16.mxu1 %v1690_v46  ;;  %1069 = vmatprep.subr.bf16.mxu0 %v1693_v48 }
  0x37   :  { %1478 = vmatmul.mubr.msk.bf16.gmra.mrb[12].mxu0 %vm137_vm0, %v62_v44  ;;  %1486 = vmatmul.mubr.msk.bf16.gmra.mrb[12].mxu1 %vm137_vm0, %v62_v44  ;;  %v2014_v44 = vrot.slane %v75_v38, %v91_v40 }
  0x38   :  { %234 = vmatprep.mubr.bf16.mxu0 %v1839_v1  ;;  %347 = vmatprep.mubr.bf16.mxu1 %v1839_v1 }
  0x39   :  { %957 = vmatpush1.bf16.msra.mxu1 %v1688_v47  ;;  %1070 = vmatpush1.bf16.msra.mxu0 %v1691_v52 }
  0x3a   :  { %958 = vmatprep.subr.bf16.mxu1 %v1696_v50  ;;  %1071 = vmatprep.subr.bf16.mxu0 %v1699_v54 }
  0x3d   :  { %959 = vmatpush1.bf16.msra.mxu1 %v1694_v53  ;;  %1072 = vmatpush1.bf16.msra.mxu0 %v1697_v56 }
  0x3e   :  { %960 = vmatprep.subr.bf16.mxu1 %v1702_v57  ;;  %1073 = vmatprep.subr.bf16.mxu0 %v1705_v60 }
  0x3f   :  { %1479 = vmatmul.mubr.msk.bf16.gmra.mrb[16].mxu0 %vm137_vm0, %v63_v55  ;;  %1487 = vmatmul.mubr.msk.bf16.gmra.mrb[16].mxu1 %vm137_vm0, %v63_v55 }
  0x40   :  { %244 = vmatprep.mubr.bf16.mxu0 %v1839_v1  ;;  %357 = vmatprep.mubr.bf16.mxu1 %v1839_v1 }
  0x41   :  { %961 = vmatpush1.bf16.msra.mxu1 %v1700_v59  ;;  %1074 = vmatpush1.bf16.msra.mxu0 %v1703_v63 }
  0x42   :  { %962 = vmatprep.subr.bf16.mxu1 %v1708_v62  ;;  %1075 = vmatprep.subr.bf16.mxu0 %v1711_v2 }
  0x45   :  { %963 = vmatpush1.bf16.msra.mxu1 %v1706_v0  ;;  %1076 = vmatpush1.bf16.msra.mxu0 %v1709_v4 }
  0x46   :  { %964 = vmatprep.subr.bf16.mxu1 %v1714_v5  ;;  %1077 = vmatprep.subr.bf16.mxu0 %v1717_v7 }
  0x47   :  { %1480 = vmatmul.mubr.msk.bf16.gmra.mrb[20].mxu0 %vm137_vm0, %v64_v3  ;;  %1488 = vmatmul.mubr.msk.bf16.gmra.mrb[20].mxu1 %vm137_vm0, %v64_v3 }
  0x48   :  { %254 = vmatprep.mubr.bf16.mxu0 %v1839_v1  ;;  %367 = vmatprep.mubr.bf16.mxu1 %v1839_v1 }
  0x49   :  { %965 = vmatpush1.bf16.msra.mxu1 %v1712_v6  ;;  %1078 = vmatpush1.bf16.msra.mxu0 %v1715_v11 }
  0x4a   :  { %966 = vmatprep.subr.bf16.mxu1 %v1720_v8  ;;  %1079 = vmatprep.subr.bf16.mxu0 %v1723_v13 }
  0x4d   :  { %967 = vmatpush1.bf16.msra.mxu1 %v1718_v12  ;;  %1080 = vmatpush1.bf16.msra.mxu0 %v1721_v15 }
  0x4e   :  { %968 = vmatprep.subr.bf16.mxu1 %v1726_v16  ;;  %1081 = vmatprep.subr.bf16.mxu0 %v1729_v18 }
  0x4f   :  { %1481 = vmatmul.mubr.msk.bf16.gmra.mrb[24].mxu0 %vm137_vm0, %v65_v14  ;;  %1489 = vmatmul.mubr.msk.bf16.gmra.mrb[24].mxu1 %vm137_vm0, %v65_v14 }
  0x50   :  { %264 = vmatprep.mubr.bf16.mxu0 %v1839_v1  ;;  %377 = vmatprep.mubr.bf16.mxu1 %v1839_v1  ;;  %v1732_v1 = vld [vmem:[#allocation3 + $0xd4] ss:$8 sps:$4 sm:$0xff]  }
  0x51   :  { %969 = vmatpush1.bf16.msra.mxu1 %v1724_v17  ;;  %1082 = vmatpush1.bf16.msra.mxu0 %v1727_v21 }
  0x52   :  { %970 = vmatprep.subr.bf16.mxu1 %v1732_v1  ;;  %1083 = vmatprep.subr.bf16.mxu0 %v1735_v23 }
  0x55   :  { %971 = vmatpush1.bf16.msra.mxu1 %v1730_v24  ;;  %1084 = vmatpush1.bf16.msra.mxu0 %v1733_v25 }
  0x56   :  { %972 = vmatprep.subr.bf16.mxu1 %v1738_v26  ;;  %1085 = vmatprep.subr.bf16.mxu0 %v1741_v27 }
  0x57   :  { %1482 = vmatmul.mubr.msk.bf16.gmra.mrb[28].mxu0 %vm137_vm0, %v66_v22  ;;  %1490 = vmatmul.mubr.msk.bf16.gmra.mrb[28].mxu1 %vm137_vm0, %v66_v22 }
  0x59   :  { %973 = vmatpush1.bf16.msra.mxu1 %v1736_v28  ;;  %1086 = vmatpush1.bf16.msra.mxu0 %v1739_v29 }
  0x5a   :  { %974 = vmatprep.subr.bf16.mxu1 %v1744_v30  ;;  %1087 = vmatprep.subr.bf16.mxu0 %v1747_v31 }
  0x5d   :  { %975 = vmatpush1.bf16.msra.mxu1 %v1742_v32  ;;  %1088 = vmatpush1.bf16.msra.mxu0 %v1745_v33 }
  0xf2   :  { %v196_v45 = vpop.f32.mrb[0].mxu0  ;;  %v309_v46 = vpop.f32.mrb[0].mxu1 }
  0xf3   :  { %v197_v47 = vadd.f32 %v196_v45, %v2007_v41  ;;  %v310_v48 = vadd.f32 %v309_v46, %v2009_v42  ;;  %v198_v49 = vpop.f32.mrb[1].mxu0  ;;  %v311_v50 = vpop.f32.mrb[1].mxu1 }
  0xf4   :  { %v199_v51 = vadd.f32 %v198_v49, %v2012_v43  ;;  %v312_v52 = vadd.f32 %v311_v50, %v2014_v44  ;;  %v200_v53 = vpop.f32.mrb[2].mxu0  ;;  %v313_v54 = vpop.f32.mrb[2].mxu1 }
  0xf5   :  { %v388_v55 = vmul.f32 0.2, %v197_v47  ;;  %v390_v56 = vmul.f32 0.2, %v310_v48  ;;  %v201_v57 = vadd.f32 %v200_v53, %v2007_v41  ;;  %v314_v58 = vadd.f32 %v313_v54, %v2009_v42  ;;  %v202_v59 = vpop.f32.mrb[3].mxu0  ;;  %v315_v60 = vpop.f32.mrb[3].mxu1 }
  0xf6   :  { %v389_v61 = vmul.f32 0.2, %v199_v51  ;;  %v391_v62 = vmul.f32 0.2, %v312_v52  ;;  %v203_v63 = vadd.f32 %v202_v59, %v2012_v43  ;;  %v316_v0 = vadd.f32 %v315_v60, %v2014_v44 }
  0xf7   :  { %v392_v2 = vmul.f32 0.2, %v201_v57  ;;  %v394_v3 = vmul.f32 0.2, %v314_v58  ;;  %v452_v6 = vmax.f32 %v197_v47, %v388_v55  ;;  %v454_v7 = vmax.f32 %v310_v48, %v390_v56 }
  0xf8   :  { %v393_v4 = vmul.f32 0.2, %v203_v63  ;;  %v395_v5 = vmul.f32 0.2, %v316_v0  ;;  %v453_v10 = vmax.f32 %v199_v51, %v389_v61  ;;  %v455_v11 = vmax.f32 %v312_v52, %v391_v62 }
  0xf9   :  { %v456_v8 = vmax.f32 %v201_v57, %v392_v2  ;;  %v458_v9 = vmax.f32 %v314_v58, %v394_v3 }
  0xfa   :  { %v457_v12 = vmax.f32 %v203_v63, %v393_v4  ;;  %v459_v13 = vmax.f32 %v316_v0, %v395_v5  ;;  %v206_v14 = vpop.f32.mrb[4].mxu0  ;;  %v319_v15 = vpop.f32.mrb[4].mxu1 }
  0xfb   :  { %v516_v16 = vpack.c.bf16 %v456_v8, %v452_v6  ;;  %v518_v17 = vpack.c.bf16 %v458_v9, %v454_v7  ;;  %v207_v18 = vadd.f32 %v206_v14, %v2007_v41  ;;  %v320_v19 = vadd.f32 %v319_v15, %v2009_v42  ;;  %v208_v20 = vpop.f32.mrb[5].mxu0  ;;  %v321_v21 = vpop.f32.mrb[5].mxu1 }
  0xfc   :  { %v209_v22 = vadd.f32 %v208_v20, %v2012_v43  ;;  %v322_v1 = vadd.f32 %v321_v21, %v2014_v44  ;;  %v210_v23 = vpop.f32.mrb[6].mxu0  ;;  %v323_v24 = vpop.f32.mrb[6].mxu1  ;;  %v517_v25 = vpack.c.bf16 %v457_v12, %v453_v10  ;;  %v519_v26 = vpack.c.bf16 %v459_v13, %v455_v11 }
  0xfd   :  { %v396_v27 = vmul.f32 0.2, %v207_v18  ;;  %v398_v28 = vmul.f32 0.2, %v320_v19  ;;  %v211_v29 = vadd.f32 %v210_v23, %v2007_v41  ;;  %v324_v30 = vadd.f32 %v323_v24, %v2009_v42  ;;  %v212_v31 = vpop.f32.mrb[7].mxu0  ;;  %v325_v32 = vpop.f32.mrb[7].mxu1 }
  0xfe   :  { %v397_v33 = vmul.f32 0.2, %v209_v22  ;;  %v399_v34 = vmul.f32 0.2, %v322_v1  ;;  %v213_v35 = vadd.f32 %v212_v31, %v2012_v43  ;;  %v326_v37 = vadd.f32 %v325_v32, %v2014_v44  ;;  %976 = vmatprep.mubr.bf16.mxu1 %v517_v25  ;;  %1089 = vmatprep.mubr.bf16.mxu0 %v519_v26 }
  0xff   :  { %v400_v38 = vmul.f32 0.2, %v211_v29  ;;  %v402_v40 = vmul.f32 0.2, %v324_v30  ;;  %977 = vmatmul.mubr.bf16.vlgmr.msra.gmra.mrb[32].mxu1 %v516_v16  ;;  %1090 = vmatmul.mubr.bf16.vlgmr.msra.gmra.mrb[32].mxu0 %v518_v17  ;;  %v460_v47 = vmax.f32 %v207_v18, %v396_v27  ;;  %v462_v48 = vmax.f32 %v320_v19, %v398_v28 }
 0x100   :  { %v401_v45 = vmul.f32 0.2, %v213_v35  ;;  %v403_v46 = vmul.f32 0.2, %v326_v37  ;;  %v461_v51 = vmax.f32 %v209_v22, %v397_v33  ;;  %v463_v52 = vmax.f32 %v322_v1, %v399_v34 }
 0x101   :  { %v464_v49 = vmax.f32 %v211_v29, %v400_v38  ;;  %v466_v50 = vmax.f32 %v324_v30, %v402_v40 }
 0x102   :  { %v465_v53 = vmax.f32 %v213_v35, %v401_v45  ;;  %v467_v54 = vmax.f32 %v326_v37, %v403_v46  ;;  %v216_v55 = vpop.f32.mrb[8].mxu0  ;;  %v329_v56 = vpop.f32.mrb[8].mxu1 }
 0x103   :  { %v217_v57 = vadd.f32 %v216_v55, %v2007_v41  ;;  %v330_v58 = vadd.f32 %v329_v56, %v2009_v42  ;;  %v218_v59 = vpop.f32.mrb[9].mxu0  ;;  %v331_v60 = vpop.f32.mrb[9].mxu1  ;;  %v520_v61 = vpack.c.bf16 %v464_v49, %v460_v47  ;;  %v522_v62 = vpack.c.bf16 %v466_v50, %v462_v48 }
 0x104   :  { %v219_v63 = vadd.f32 %v218_v59, %v2012_v43  ;;  %v332_v0 = vadd.f32 %v331_v60, %v2014_v44  ;;  %v220_v2 = vpop.f32.mrb[10].mxu0  ;;  %v333_v3 = vpop.f32.mrb[10].mxu1  ;;  %v521_v4 = vpack.c.bf16 %v465_v53, %v461_v51  ;;  %v523_v5 = vpack.c.bf16 %v467_v54, %v463_v52 }
 0x105   :  { %v404_v6 = vmul.f32 0.2, %v217_v57  ;;  %v406_v7 = vmul.f32 0.2, %v330_v58  ;;  %v221_v8 = vadd.f32 %v220_v2, %v2007_v41  ;;  %v334_v9 = vadd.f32 %v333_v3, %v2009_v42  ;;  %v222_v10 = vpop.f32.mrb[11].mxu0  ;;  %v335_v11 = vpop.f32.mrb[11].mxu1 }
 0x106   :  { %v405_v12 = vmul.f32 0.2, %v219_v63  ;;  %v407_v13 = vmul.f32 0.2, %v332_v0  ;;  %v223_v14 = vadd.f32 %v222_v10, %v2012_v43  ;;  %v336_v15 = vadd.f32 %v335_v11, %v2014_v44  ;;  %986 = vmatprep.mubr.bf16.mxu1 %v521_v4  ;;  %1099 = vmatprep.mubr.bf16.mxu0 %v523_v5 }
 0x107   :  { %v408_v16 = vmul.f32 0.2, %v221_v8  ;;  %v410_v17 = vmul.f32 0.2, %v334_v9  ;;  %987 = vmatmul.mubr.bf16.gmra.mrb[36].mxu1 %v520_v61  ;;  %1100 = vmatmul.mubr.bf16.gmra.mrb[36].mxu0 %v522_v62  ;;  %v468_v20 = vmax.f32 %v217_v57, %v404_v6  ;;  %v470_v21 = vmax.f32 %v330_v58, %v406_v7 }
 0x108   :  { %v409_v18 = vmul.f32 0.2, %v223_v14  ;;  %v411_v19 = vmul.f32 0.2, %v336_v15  ;;  %v469_v23 = vmax.f32 %v219_v63, %v405_v12  ;;  %v471_v24 = vmax.f32 %v332_v0, %v407_v13 }
 0x109   :  { %v472_v22 = vmax.f32 %v221_v8, %v408_v16  ;;  %v474_v1 = vmax.f32 %v334_v9, %v410_v17 }
 0x10a   :  { %v473_v25 = vmax.f32 %v223_v14, %v409_v18  ;;  %v475_v26 = vmax.f32 %v336_v15, %v411_v19  ;;  %v226_v27 = vpop.f32.mrb[12].mxu0  ;;  %v339_v28 = vpop.f32.mrb[12].mxu1 }
 0x10b   :  { %v227_v29 = vadd.f32 %v226_v27, %v2007_v41  ;;  %v340_v30 = vadd.f32 %v339_v28, %v2009_v42  ;;  %v228_v31 = vpop.f32.mrb[13].mxu0  ;;  %v341_v32 = vpop.f32.mrb[13].mxu1  ;;  %v524_v33 = vpack.c.bf16 %v472_v22, %v468_v20  ;;  %v526_v34 = vpack.c.bf16 %v474_v1, %v470_v21 }
 0x10c   :  { %v229_v35 = vadd.f32 %v228_v31, %v2012_v43  ;;  %v342_v37 = vadd.f32 %v341_v32, %v2014_v44  ;;  %v230_v38 = vpop.f32.mrb[14].mxu0  ;;  %v343_v40 = vpop.f32.mrb[14].mxu1  ;;  %v525_v45 = vpack.c.bf16 %v473_v25, %v469_v23  ;;  %v527_v46 = vpack.c.bf16 %v475_v26, %v471_v24 }
 0x10d   :  { %v412_v47 = vmul.f32 0.2, %v227_v29  ;;  %v414_v48 = vmul.f32 0.2, %v340_v30  ;;  %v231_v49 = vadd.f32 %v230_v38, %v2007_v41  ;;  %v344_v50 = vadd.f32 %v343_v40, %v2009_v42  ;;  %v232_v51 = vpop.f32.mrb[15].mxu0  ;;  %v345_v52 = vpop.f32.mrb[15].mxu1 }
 0x10e   :  { %v413_v53 = vmul.f32 0.2, %v229_v35  ;;  %v415_v54 = vmul.f32 0.2, %v342_v37  ;;  %v233_v55 = vadd.f32 %v232_v51, %v2012_v43  ;;  %v346_v56 = vadd.f32 %v345_v52, %v2014_v44  ;;  %996 = vmatprep.mubr.bf16.mxu1 %v525_v45  ;;  %1109 = vmatprep.mubr.bf16.mxu0 %v527_v46 }
 0x10f   :  { %v416_v57 = vmul.f32 0.2, %v231_v49  ;;  %v418_v58 = vmul.f32 0.2, %v344_v50  ;;  %997 = vmatmul.mubr.bf16.gmra.mrb[40].mxu1 %v524_v33  ;;  %1110 = vmatmul.mubr.bf16.gmra.mrb[40].mxu0 %v526_v34  ;;  %v476_v61 = vmax.f32 %v227_v29, %v412_v47  ;;  %v478_v62 = vmax.f32 %v340_v30, %v414_v48 }
 0x110   :  { %v417_v59 = vmul.f32 0.2, %v233_v55  ;;  %v419_v60 = vmul.f32 0.2, %v346_v56  ;;  %v477_v2 = vmax.f32 %v229_v35, %v413_v53  ;;  %v479_v3 = vmax.f32 %v342_v37, %v415_v54 }
 0x111   :  { %v480_v63 = vmax.f32 %v231_v49, %v416_v57  ;;  %v482_v0 = vmax.f32 %v344_v50, %v418_v58 }
 0x112   :  { %v481_v4 = vmax.f32 %v233_v55, %v417_v59  ;;  %v483_v5 = vmax.f32 %v346_v56, %v419_v60  ;;  %v236_v6 = vpop.f32.mrb[16].mxu0  ;;  %v349_v7 = vpop.f32.mrb[16].mxu1 }
 0x113   :  { %v237_v8 = vadd.f32 %v236_v6, %v2007_v41  ;;  %v350_v9 = vadd.f32 %v349_v7, %v2009_v42  ;;  %v238_v10 = vpop.f32.mrb[17].mxu0  ;;  %v351_v11 = vpop.f32.mrb[17].mxu1  ;;  %v528_v12 = vpack.c.bf16 %v480_v63, %v476_v61  ;;  %v530_v13 = vpack.c.bf16 %v482_v0, %v478_v62 }
 0x114   :  { %v239_v14 = vadd.f32 %v238_v10, %v2012_v43  ;;  %v352_v15 = vadd.f32 %v351_v11, %v2014_v44  ;;  %v240_v16 = vpop.f32.mrb[18].mxu0  ;;  %v353_v17 = vpop.f32.mrb[18].mxu1  ;;  %v529_v18 = vpack.c.bf16 %v481_v4, %v477_v2  ;;  %v531_v19 = vpack.c.bf16 %v483_v5, %v479_v3 }
 0x115   :  { %v420_v20 = vmul.f32 0.2, %v237_v8  ;;  %v422_v21 = vmul.f32 0.2, %v350_v9  ;;  %v241_v22 = vadd.f32 %v240_v16, %v2007_v41  ;;  %v354_v1 = vadd.f32 %v353_v17, %v2009_v42  ;;  %v242_v23 = vpop.f32.mrb[19].mxu0  ;;  %v355_v24 = vpop.f32.mrb[19].mxu1 }
 0x116   :  { %v421_v25 = vmul.f32 0.2, %v239_v14  ;;  %v423_v26 = vmul.f32 0.2, %v352_v15  ;;  %v243_v27 = vadd.f32 %v242_v23, %v2012_v43  ;;  %v356_v28 = vadd.f32 %v355_v24, %v2014_v44  ;;  %1006 = vmatprep.mubr.bf16.mxu1 %v529_v18  ;;  %1119 = vmatprep.mubr.bf16.mxu0 %v531_v19 }
 0x117   :  { %v424_v29 = vmul.f32 0.2, %v241_v22  ;;  %v426_v30 = vmul.f32 0.2, %v354_v1  ;;  %1007 = vmatmul.mubr.bf16.gmra.mrb[44].mxu1 %v528_v12  ;;  %1120 = vmatmul.mubr.bf16.gmra.mrb[44].mxu0 %v530_v13  ;;  %v484_v33 = vmax.f32 %v237_v8, %v420_v20  ;;  %v486_v34 = vmax.f32 %v350_v9, %v422_v21 }
 0x118   :  { %v425_v31 = vmul.f32 0.2, %v243_v27  ;;  %v427_v32 = vmul.f32 0.2, %v356_v28  ;;  %v485_v38 = vmax.f32 %v239_v14, %v421_v25  ;;  %v487_v40 = vmax.f32 %v352_v15, %v423_v26 }
 0x119   :  { %v488_v35 = vmax.f32 %v241_v22, %v424_v29  ;;  %v490_v37 = vmax.f32 %v354_v1, %v426_v30 }
 0x11a   :  { %v489_v45 = vmax.f32 %v243_v27, %v425_v31  ;;  %v491_v46 = vmax.f32 %v356_v28, %v427_v32  ;;  %v246_v47 = vpop.f32.mrb[20].mxu0  ;;  %v359_v48 = vpop.f32.mrb[20].mxu1 }
 0x11b   :  { %v247_v49 = vadd.f32 %v246_v47, %v2007_v41  ;;  %v360_v50 = vadd.f32 %v359_v48, %v2009_v42  ;;  %v248_v51 = vpop.f32.mrb[21].mxu0  ;;  %v361_v52 = vpop.f32.mrb[21].mxu1  ;;  %v532_v53 = vpack.c.bf16 %v488_v35, %v484_v33  ;;  %v534_v54 = vpack.c.bf16 %v490_v37, %v486_v34 }
 0x11c   :  { %v249_v55 = vadd.f32 %v248_v51, %v2012_v43  ;;  %v362_v56 = vadd.f32 %v361_v52, %v2014_v44  ;;  %v250_v57 = vpop.f32.mrb[22].mxu0  ;;  %v363_v58 = vpop.f32.mrb[22].mxu1  ;;  %v533_v59 = vpack.c.bf16 %v489_v45, %v485_v38  ;;  %v535_v60 = vpack.c.bf16 %v491_v46, %v487_v40 }
 0x11d   :  { %v428_v61 = vmul.f32 0.2, %v247_v49  ;;  %v430_v62 = vmul.f32 0.2, %v360_v50  ;;  %v251_v63 = vadd.f32 %v250_v57, %v2007_v41  ;;  %v364_v0 = vadd.f32 %v363_v58, %v2009_v42  ;;  %v252_v2 = vpop.f32.mrb[23].mxu0  ;;  %v365_v3 = vpop.f32.mrb[23].mxu1 }
 0x11e   :  { %v429_v4 = vmul.f32 0.2, %v249_v55  ;;  %v431_v5 = vmul.f32 0.2, %v362_v56  ;;  %v253_v6 = vadd.f32 %v252_v2, %v2012_v43  ;;  %v366_v7 = vadd.f32 %v365_v3, %v2014_v44  ;;  %1016 = vmatprep.mubr.bf16.mxu1 %v533_v59  ;;  %1129 = vmatprep.mubr.bf16.mxu0 %v535_v60 }
 0x11f   :  { %v432_v8 = vmul.f32 0.2, %v251_v63  ;;  %v434_v9 = vmul.f32 0.2, %v364_v0  ;;  %1017 = vmatmul.mubr.bf16.gmra.mrb[48].mxu1 %v532_v53  ;;  %1130 = vmatmul.mubr.bf16.gmra.mrb[48].mxu0 %v534_v54  ;;  %v492_v12 = vmax.f32 %v247_v49, %v428_v61  ;;  %v494_v13 = vmax.f32 %v360_v50, %v430_v62 }
 0x120   :  { %v433_v10 = vmul.f32 0.2, %v253_v6  ;;  %v435_v11 = vmul.f32 0.2, %v366_v7  ;;  %v493_v16 = vmax.f32 %v249_v55, %v429_v4  ;;  %v495_v17 = vmax.f32 %v362_v56, %v431_v5 }
 0x121   :  { %v496_v14 = vmax.f32 %v251_v63, %v432_v8  ;;  %v498_v15 = vmax.f32 %v364_v0, %v434_v9 }
 0x122   :  { %v497_v18 = vmax.f32 %v253_v6, %v433_v10  ;;  %v499_v19 = vmax.f32 %v366_v7, %v435_v11  ;;  %v256_v20 = vpop.f32.mrb[24].mxu0  ;;  %v369_v21 = vpop.f32.mrb[24].mxu1 }
 0x123   :  { %v257_v22 = vadd.f32 %v256_v20, %v2007_v41  ;;  %v370_v1 = vadd.f32 %v369_v21, %v2009_v42  ;;  %v258_v23 = vpop.f32.mrb[25].mxu0  ;;  %v371_v24 = vpop.f32.mrb[25].mxu1  ;;  %v536_v25 = vpack.c.bf16 %v496_v14, %v492_v12  ;;  %v538_v26 = vpack.c.bf16 %v498_v15, %v494_v13 }
 0x124   :  { %v259_v27 = vadd.f32 %v258_v23, %v2012_v43  ;;  %v372_v28 = vadd.f32 %v371_v24, %v2014_v44  ;;  %v260_v29 = vpop.f32.mrb[26].mxu0  ;;  %v373_v30 = vpop.f32.mrb[26].mxu1  ;;  %v537_v31 = vpack.c.bf16 %v497_v18, %v493_v16  ;;  %v539_v32 = vpack.c.bf16 %v499_v19, %v495_v17 }
 0x125   :  { %v436_v33 = vmul.f32 0.2, %v257_v22  ;;  %v438_v34 = vmul.f32 0.2, %v370_v1  ;;  %v261_v35 = vadd.f32 %v260_v29, %v2007_v41  ;;  %v374_v37 = vadd.f32 %v373_v30, %v2009_v42  ;;  %v262_v38 = vpop.f32.mrb[27].mxu0  ;;  %v375_v40 = vpop.f32.mrb[27].mxu1 }
 0x126   :  { %v437_v45 = vmul.f32 0.2, %v259_v27  ;;  %v439_v46 = vmul.f32 0.2, %v372_v28  ;;  %v263_v47 = vadd.f32 %v262_v38, %v2012_v43  ;;  %v376_v48 = vadd.f32 %v375_v40, %v2014_v44  ;;  %1026 = vmatprep.mubr.bf16.mxu1 %v537_v31  ;;  %1139 = vmatprep.mubr.bf16.mxu0 %v539_v32 }
 0x127   :  { %v440_v49 = vmul.f32 0.2, %v261_v35  ;;  %v442_v50 = vmul.f32 0.2, %v374_v37  ;;  %1027 = vmatmul.mubr.bf16.gmra.mrb[52].mxu1 %v536_v25  ;;  %1140 = vmatmul.mubr.bf16.gmra.mrb[52].mxu0 %v538_v26  ;;  %v500_v53 = vmax.f32 %v257_v22, %v436_v33  ;;  %v502_v54 = vmax.f32 %v370_v1, %v438_v34  ;;  %v612_v33 = vld [vmem:[%s2248_s4] sm:$0x3] }
 0x128   :  { %v441_v51 = vmul.f32 0.2, %v263_v47  ;;  %v443_v52 = vmul.f32 0.2, %v376_v48  ;;  %v501_v57 = vmax.f32 %v259_v27, %v437_v45  ;;  %v503_v58 = vmax.f32 %v372_v28, %v439_v46 }
 0x129   :  { %v504_v55 = vmax.f32 %v261_v35, %v440_v49  ;;  %v506_v56 = vmax.f32 %v374_v37, %v442_v50  ;;  %v2084_v34 = vrot.slane %v612_v33, %v1999_v36  ;;  %v2087_v35 = vrot.slane %v612_v33, %v2004_v39  ;;  %v1234_v50 = vld [vmem:[%s2249_s5] sm:$0x3] }
 0x12a   :  { %v505_v59 = vmax.f32 %v263_v47, %v441_v51  ;;  %v507_v60 = vmax.f32 %v376_v48, %v443_v52  ;;  %v266_v61 = vpop.f32.mrb[28].mxu0  ;;  %v379_v62 = vpop.f32.mrb[28].mxu1 }
 0x12b   :  { %v267_v63 = vadd.f32 %v266_v61, %v2007_v41  ;;  %v380_v0 = vadd.f32 %v379_v62, %v2009_v42  ;;  %v268_v2 = vpop.f32.mrb[29].mxu0  ;;  %v381_v3 = vpop.f32.mrb[29].mxu1  ;;  %v540_v4 = vpack.c.bf16 %v504_v55, %v500_v53  ;;  %v542_v5 = vpack.c.bf16 %v506_v56, %v502_v54 }
 0x12c   :  { %v269_v6 = vadd.f32 %v268_v2, %v2012_v43  ;;  %v382_v7 = vadd.f32 %v381_v3, %v2014_v44  ;;  %v270_v8 = vpop.f32.mrb[30].mxu0  ;;  %v383_v9 = vpop.f32.mrb[30].mxu1  ;;  %v541_v10 = vpack.c.bf16 %v505_v59, %v501_v57  ;;  %v543_v11 = vpack.c.bf16 %v507_v60, %v503_v58 }
 0x12d   :  { %v444_v12 = vmul.f32 0.2, %v267_v63  ;;  %v446_v13 = vmul.f32 0.2, %v380_v0  ;;  %v271_v14 = vadd.f32 %v270_v8, %v2007_v41  ;;  %v384_v15 = vadd.f32 %v383_v9, %v2009_v42  ;;  %v272_v16 = vpop.f32.mrb[31].mxu0  ;;  %v385_v17 = vpop.f32.mrb[31].mxu1 }
 0x12e   :  { %v445_v18 = vmul.f32 0.2, %v269_v6  ;;  %v447_v19 = vmul.f32 0.2, %v382_v7  ;;  %v273_v20 = vadd.f32 %v272_v16, %v2012_v43  ;;  %v386_v21 = vadd.f32 %v385_v17, %v2014_v44  ;;  %1036 = vmatprep.mubr.bf16.mxu1 %v541_v10  ;;  %1149 = vmatprep.mubr.bf16.mxu0 %v543_v11 }
 0x12f   :  { %v448_v22 = vmul.f32 0.2, %v271_v14  ;;  %v450_v1 = vmul.f32 0.2, %v384_v15  ;;  %1037 = vmatmul.mubr.bf16.gmra.mrb[56].mxu1 %v540_v4  ;;  %1150 = vmatmul.mubr.bf16.gmra.mrb[56].mxu0 %v542_v5  ;;  %v508_v25 = vmax.f32 %v267_v63, %v444_v12  ;;  %v510_v41 = vmax.f32 %v380_v0, %v446_v13 }
 0x130   :  { %v449_v23 = vmul.f32 0.2, %v273_v20  ;;  %v451_v24 = vmul.f32 0.2, %v386_v21  ;;  %v509_v27 = vmax.f32 %v269_v6, %v445_v18  ;;  %v511_v28 = vmax.f32 %v382_v7, %v447_v19 }
 0x131   :  { %v512_v26 = vmax.f32 %v271_v14, %v448_v22  ;;  %v514_v42 = vmax.f32 %v384_v15, %v450_v1  ;;  %v2097_v59 = vrot.slane %v1234_v50, %v1999_v36  ;;  %v2100_v62 = vrot.slane %v1234_v50, %v2004_v39 }
 0x132   :  { %v513_v29 = vmax.f32 %v273_v20, %v449_v23  ;;  %v515_v30 = vmax.f32 %v386_v21, %v451_v24 }
 0x133   :  { %v544_v31 = vpack.c.bf16 %v512_v26, %v508_v25  ;;  %v546_v43 = vpack.c.bf16 %v514_v42, %v510_v41 }
 0x134   :  { %v545_v32 = vpack.c.bf16 %v513_v29, %v509_v27  ;;  %v547_v44 = vpack.c.bf16 %v515_v30, %v511_v28 }
 0x136   :  { %1046 = vmatprep.mubr.bf16.mxu1 %v545_v32  ;;  %1159 = vmatprep.mubr.bf16.mxu0 %v547_v44 }
 0x137   :  { %1047 = vmatmul.mubr.bf16.gmra.mrb[60].mxu1 %v544_v31  ;;  %1160 = vmatmul.mubr.bf16.gmra.mrb[60].mxu0 %v546_v43 }
 0x1d2   :  { %v978_v37 = vpop.f32.mrb[32].mxu1  ;;  %v1091_v38 = vpop.f32.mrb[32].mxu0 }
 0x1d3   :  { %v979_v40 = vadd.f32 %v978_v37, %v2084_v34  ;;  %v980_v45 = vpop.f32.mrb[33].mxu1  ;;  %v1093_v46 = vpop.f32.mrb[33].mxu0 }
 0x1d4   :  { %v981_v47 = vadd.f32 %v980_v45, %v2087_v35  ;;  %v982_v48 = vpop.f32.mrb[34].mxu1  ;;  %v1095_v49 = vpop.f32.mrb[34].mxu0 }
 0x1d5   :  { %v1092_v51 = vadd.f32 %v1091_v38, %v979_v40  ;;  %v983_v52 = vadd.f32 %v982_v48, %v2084_v34  ;;  %v984_v53 = vpop.f32.mrb[35].mxu1  ;;  %v1097_v54 = vpop.f32.mrb[35].mxu0 }
 0x1d6   :  { %v1094_v55 = vadd.f32 %v1093_v46, %v981_v47  ;;  %v985_v56 = vadd.f32 %v984_v53, %v2087_v35 }
 0x1d7   :  { %v1170_v57 = vmul.f32 0.2, %v1092_v51  ;;  %v1096_v58 = vadd.f32 %v1095_v49, %v983_v52 }
 0x1d8   :  { %v1171_v60 = vmul.f32 0.2, %v1094_v55  ;;  %v1098_v61 = vadd.f32 %v1097_v54, %v985_v56 }
 0x1d9   :  { %v1202_v63 = vmax.f32 %v1092_v51, %v1170_v57  ;;  %v1172_v0 = vmul.f32 0.2, %v1096_v58 }
 0x1da   :  { %v1203_v2 = vmax.f32 %v1094_v55, %v1171_v60  ;;  %v1173_v3 = vmul.f32 0.2, %v1098_v61  ;;  %v988_v4 = vpop.f32.mrb[36].mxu1  ;;  %v1101_v5 = vpop.f32.mrb[36].mxu0 }
 0x1db   :  { %v1204_v6 = vmax.f32 %v1096_v58, %v1172_v0  ;;  %v989_v7 = vadd.f32 %v988_v4, %v2084_v34  ;;  %v990_v8 = vpop.f32.mrb[37].mxu1  ;;  %v1103_v9 = vpop.f32.mrb[37].mxu0  ;;  %v1246_v10 = vmul.f32 %v2097_v59, %v1202_v63 }
 0x1dc   :  { %v1205_v36 = vmax.f32 %v1098_v61, %v1173_v3  ;;  %v991_v11 = vadd.f32 %v990_v8, %v2087_v35  ;;  %v992_v12 = vpop.f32.mrb[38].mxu1  ;;  %v1105_v13 = vpop.f32.mrb[38].mxu0  ;;  %v1247_v39 = vmul.f32 %v2100_v62, %v1203_v2 }
 0x1dd   :  { %v1102_v14 = vadd.f32 %v1101_v5, %v989_v7  ;;  %v993_v15 = vadd.f32 %v992_v12, %v2084_v34  ;;  %v994_v16 = vpop.f32.mrb[39].mxu1  ;;  %v1107_v17 = vpop.f32.mrb[39].mxu0  ;;  %v1248_v18 = vmul.f32 %v2097_v59, %v1204_v6 }
 0x1de   :  { %v1104_v19 = vadd.f32 %v1103_v9, %v991_v11  ;;  %v995_v20 = vadd.f32 %v994_v16, %v2087_v35  ;;  %v1278_v21 = vadd.f32 %v1247_v39, %v1246_v10  ;;  %v1249_v22 = vmul.f32 %v2100_v62, %v1205_v36 }
 0x1df   :  { %v1174_v1 = vmul.f32 0.2, %v1102_v14  ;;  %v1106_v23 = vadd.f32 %v1105_v13, %v993_v15 }
 0x1e0   :  { %v1175_v24 = vmul.f32 0.2, %v1104_v19  ;;  %v1108_v25 = vadd.f32 %v1107_v17, %v995_v20  ;;  %1279 = vadd.xlane.f32.xlu0 %v1278_v21  ;;  %v1281_v41 = vadd.f32 %v1249_v22, %v1248_v18 }
 0x1e1   :  { %v1206_v26 = vmax.f32 %v1102_v14, %v1174_v1  ;;  %v1176_v42 = vmul.f32 0.2, %v1106_v23 }
 0x1e2   :  { %v1207_v27 = vmax.f32 %v1104_v19, %v1175_v24  ;;  %v1177_v28 = vmul.f32 0.2, %v1108_v25  ;;  %v998_v29 = vpop.f32.mrb[40].mxu1  ;;  %v1111_v30 = vpop.f32.mrb[40].mxu0 }
 0x1e3   :  { %v1208_v31 = vmax.f32 %v1106_v23, %v1176_v42  ;;  %v999_v43 = vadd.f32 %v998_v29, %v2084_v34  ;;  %v1000_v32 = vpop.f32.mrb[41].mxu1  ;;  %v1113_v44 = vpop.f32.mrb[41].mxu0  ;;  %v1250_v33 = vmul.f32 %v2097_v59, %v1206_v26 }
 0x1e4   :  { %v1209_v37 = vmax.f32 %v1108_v25, %v1177_v28  ;;  %v1001_v38 = vadd.f32 %v1000_v32, %v2087_v35  ;;  %v1002_v40 = vpop.f32.mrb[42].mxu1  ;;  %v1115_v45 = vpop.f32.mrb[42].mxu0  ;;  %1282 = vadd.xlane.f32.xlu0 %v1281_v41  ;;  %v1251_v46 = vmul.f32 %v2100_v62, %v1207_v27 }
 0x1e5   :  { %v1112_v47 = vadd.f32 %v1111_v30, %v999_v43  ;;  %v1003_v48 = vadd.f32 %v1002_v40, %v2084_v34  ;;  %v1004_v49 = vpop.f32.mrb[43].mxu1  ;;  %v1117_v50 = vpop.f32.mrb[43].mxu0  ;;  %v1252_v51 = vmul.f32 %v2097_v59, %v1208_v31 }
 0x1e6   :  { %v1114_v52 = vadd.f32 %v1113_v44, %v1001_v38  ;;  %v1005_v53 = vadd.f32 %v1004_v49, %v2087_v35  ;;  %v1284_v54 = vadd.f32 %v1251_v46, %v1250_v33  ;;  %v1253_v55 = vmul.f32 %v2100_v62, %v1209_v37 }
 0x1e7   :  { %v1178_v56 = vmul.f32 0.2, %v1112_v47  ;;  %v1116_v57 = vadd.f32 %v1115_v45, %v1003_v48 }
 0x1e8   :  { %v1179_v58 = vmul.f32 0.2, %v1114_v52  ;;  %v1118_v60 = vadd.f32 %v1117_v50, %v1005_v53  ;;  %1285 = vadd.xlane.f32.xlu1 %v1284_v54  ;;  %v1287_v61 = vadd.f32 %v1253_v55, %v1252_v51 }
 0x1e9   :  { %v1210_v63 = vmax.f32 %v1112_v47, %v1178_v56  ;;  %v1180_v0 = vmul.f32 0.2, %v1116_v57 }
 0x1ea   :  { %v1211_v2 = vmax.f32 %v1114_v52, %v1179_v58  ;;  %v1181_v3 = vmul.f32 0.2, %v1118_v60  ;;  %v1008_v4 = vpop.f32.mrb[44].mxu1  ;;  %v1121_v5 = vpop.f32.mrb[44].mxu0 }
 0x1eb   :  { %v1212_v6 = vmax.f32 %v1116_v57, %v1180_v0  ;;  %v1009_v7 = vadd.f32 %v1008_v4, %v2084_v34  ;;  %v1010_v8 = vpop.f32.mrb[45].mxu1  ;;  %v1123_v9 = vpop.f32.mrb[45].mxu0  ;;  %v1254_v10 = vmul.f32 %v2097_v59, %v1210_v63 }
 0x1ec   :  { %v1213_v36 = vmax.f32 %v1118_v60, %v1181_v3  ;;  %v1011_v11 = vadd.f32 %v1010_v8, %v2087_v35  ;;  %v1012_v12 = vpop.f32.mrb[46].mxu1  ;;  %v1125_v13 = vpop.f32.mrb[46].mxu0  ;;  %1288 = vadd.xlane.f32.xlu1 %v1287_v61  ;;  %v1255_v39 = vmul.f32 %v2100_v62, %v1211_v2 }
 0x1ed   :  { %v1122_v14 = vadd.f32 %v1121_v5, %v1009_v7  ;;  %v1013_v15 = vadd.f32 %v1012_v12, %v2084_v34  ;;  %v1014_v16 = vpop.f32.mrb[47].mxu1  ;;  %v1127_v17 = vpop.f32.mrb[47].mxu0  ;;  %v1256_v18 = vmul.f32 %v2097_v59, %v1212_v6 }
 0x1ee   :  { %v1124_v19 = vadd.f32 %v1123_v9, %v1011_v11  ;;  %v1015_v20 = vadd.f32 %v1014_v16, %v2087_v35  ;;  %v1290_v21 = vadd.f32 %v1255_v39, %v1254_v10  ;;  %v1257_v22 = vmul.f32 %v2100_v62, %v1213_v36 }
 0x1ef   :  { %v1182_v1 = vmul.f32 0.2, %v1122_v14  ;;  %v1126_v23 = vadd.f32 %v1125_v13, %v1013_v15 }
 0x1f0   :  { %v1183_v24 = vmul.f32 0.2, %v1124_v19  ;;  %v1128_v25 = vadd.f32 %v1127_v17, %v1015_v20  ;;  %1291 = vadd.xlane.f32.xlu0 %v1290_v21  ;;  %v1293_v41 = vadd.f32 %v1257_v22, %v1256_v18 }
 0x1f1   :  { %v1214_v26 = vmax.f32 %v1122_v14, %v1182_v1  ;;  %v1184_v42 = vmul.f32 0.2, %v1126_v23 }
 0x1f2   :  { %v1215_v27 = vmax.f32 %v1124_v19, %v1183_v24  ;;  %v1185_v28 = vmul.f32 0.2, %v1128_v25  ;;  %v1018_v29 = vpop.f32.mrb[48].mxu1  ;;  %v1131_v30 = vpop.f32.mrb[48].mxu0  ;;  %1294 = vadd.xlane.f32.xlu1 %v1293_v41 }
 0x1f3   :  { %v1216_v31 = vmax.f32 %v1126_v23, %v1184_v42  ;;  %v1019_v43 = vadd.f32 %v1018_v29, %v2084_v34  ;;  %v1020_v32 = vpop.f32.mrb[49].mxu1  ;;  %v1133_v44 = vpop.f32.mrb[49].mxu0  ;;  %v1258_v33 = vmul.f32 %v2097_v59, %v1214_v26 }
 0x1f4   :  { %v1217_v37 = vmax.f32 %v1128_v25, %v1185_v28  ;;  %v1021_v38 = vadd.f32 %v1020_v32, %v2087_v35  ;;  %v1022_v40 = vpop.f32.mrb[50].mxu1  ;;  %v1135_v45 = vpop.f32.mrb[50].mxu0  ;;  %v1259_v46 = vmul.f32 %v2100_v62, %v1215_v27 }
 0x1f5   :  { %v1132_v47 = vadd.f32 %v1131_v30, %v1019_v43  ;;  %v1023_v48 = vadd.f32 %v1022_v40, %v2084_v34  ;;  %v1024_v49 = vpop.f32.mrb[51].mxu1  ;;  %v1137_v50 = vpop.f32.mrb[51].mxu0  ;;  %v1260_v51 = vmul.f32 %v2097_v59, %v1216_v31 }
 0x1f6   :  { %v1134_v52 = vadd.f32 %v1133_v44, %v1021_v38  ;;  %v1025_v53 = vadd.f32 %v1024_v49, %v2087_v35  ;;  %v1296_v54 = vadd.f32 %v1259_v46, %v1258_v33  ;;  %v1261_v55 = vmul.f32 %v2100_v62, %v1217_v37 }
 0x1f7   :  { %v1186_v56 = vmul.f32 0.2, %v1132_v47  ;;  %v1136_v57 = vadd.f32 %v1135_v45, %v1023_v48 }
 0x1f8   :  { %v1187_v58 = vmul.f32 0.2, %v1134_v52  ;;  %v1138_v60 = vadd.f32 %v1137_v50, %v1025_v53  ;;  %1297 = vadd.xlane.f32.xlu0 %v1296_v54  ;;  %v1299_v61 = vadd.f32 %v1261_v55, %v1260_v51 }
 0x1f9   :  { %v1218_v63 = vmax.f32 %v1132_v47, %v1186_v56  ;;  %v1188_v0 = vmul.f32 0.2, %v1136_v57 }
 0x1fa   :  { %v1219_v2 = vmax.f32 %v1134_v52, %v1187_v58  ;;  %v1189_v3 = vmul.f32 0.2, %v1138_v60  ;;  %v1028_v4 = vpop.f32.mrb[52].mxu1  ;;  %v1141_v5 = vpop.f32.mrb[52].mxu0  ;;  %1300 = vadd.xlane.f32.xlu1 %v1299_v61 }
 0x1fb   :  { %v1220_v6 = vmax.f32 %v1136_v57, %v1188_v0  ;;  %v1029_v7 = vadd.f32 %v1028_v4, %v2084_v34  ;;  %v1030_v8 = vpop.f32.mrb[53].mxu1  ;;  %v1143_v9 = vpop.f32.mrb[53].mxu0  ;;  %v1262_v10 = vmul.f32 %v2097_v59, %v1218_v63 }
 0x1fc   :  { %v1221_v36 = vmax.f32 %v1138_v60, %v1189_v3  ;;  %v1031_v11 = vadd.f32 %v1030_v8, %v2087_v35  ;;  %v1032_v12 = vpop.f32.mrb[54].mxu1  ;;  %v1145_v13 = vpop.f32.mrb[54].mxu0  ;;  %v1263_v39 = vmul.f32 %v2100_v62, %v1219_v2 }
 0x1fd   :  { %v1142_v14 = vadd.f32 %v1141_v5, %v1029_v7  ;;  %v1033_v15 = vadd.f32 %v1032_v12, %v2084_v34  ;;  %v1034_v16 = vpop.f32.mrb[55].mxu1  ;;  %v1147_v17 = vpop.f32.mrb[55].mxu0  ;;  %v1264_v18 = vmul.f32 %v2097_v59, %v1220_v6 }
 0x1fe   :  { %v1144_v19 = vadd.f32 %v1143_v9, %v1031_v11  ;;  %v1035_v20 = vadd.f32 %v1034_v16, %v2087_v35  ;;  %v1302_v21 = vadd.f32 %v1263_v39, %v1262_v10  ;;  %v1265_v22 = vmul.f32 %v2100_v62, %v1221_v36 }
 0x1ff   :  { %v1190_v1 = vmul.f32 0.2, %v1142_v14  ;;  %v1146_v23 = vadd.f32 %v1145_v13, %v1033_v15 }
 0x200   :  { %v1191_v24 = vmul.f32 0.2, %v1144_v19  ;;  %v1148_v25 = vadd.f32 %v1147_v17, %v1035_v20  ;;  %1303 = vadd.xlane.f32.xlu0 %v1302_v21  ;;  %v1305_v41 = vadd.f32 %v1265_v22, %v1264_v18 }
 0x201   :  { %v1222_v26 = vmax.f32 %v1142_v14, %v1190_v1  ;;  %v1192_v42 = vmul.f32 0.2, %v1146_v23 }
 0x202   :  { %v1223_v27 = vmax.f32 %v1144_v19, %v1191_v24  ;;  %v1193_v28 = vmul.f32 0.2, %v1148_v25  ;;  %v1038_v29 = vpop.f32.mrb[56].mxu1  ;;  %v1151_v30 = vpop.f32.mrb[56].mxu0  ;;  %1306 = vadd.xlane.f32.xlu1 %v1305_v41 }
 0x203   :  { %v1224_v31 = vmax.f32 %v1146_v23, %v1192_v42  ;;  %v1039_v43 = vadd.f32 %v1038_v29, %v2084_v34  ;;  %v1040_v32 = vpop.f32.mrb[57].mxu1  ;;  %v1153_v44 = vpop.f32.mrb[57].mxu0  ;;  %v1266_v33 = vmul.f32 %v2097_v59, %v1222_v26 }
 0x204   :  { %v1225_v37 = vmax.f32 %v1148_v25, %v1193_v28  ;;  %v1041_v38 = vadd.f32 %v1040_v32, %v2087_v35  ;;  %v1042_v40 = vpop.f32.mrb[58].mxu1  ;;  %v1155_v45 = vpop.f32.mrb[58].mxu0  ;;  %v1267_v46 = vmul.f32 %v2100_v62, %v1223_v27 }
 0x205   :  { %v1152_v47 = vadd.f32 %v1151_v30, %v1039_v43  ;;  %v1043_v48 = vadd.f32 %v1042_v40, %v2084_v34  ;;  %v1044_v49 = vpop.f32.mrb[59].mxu1  ;;  %v1157_v50 = vpop.f32.mrb[59].mxu0  ;;  %v1268_v51 = vmul.f32 %v2097_v59, %v1224_v31 }
 0x206   :  { %v1154_v52 = vadd.f32 %v1153_v44, %v1041_v38  ;;  %v1045_v53 = vadd.f32 %v1044_v49, %v2087_v35  ;;  %v1308_v54 = vadd.f32 %v1267_v46, %v1266_v33  ;;  %v1269_v55 = vmul.f32 %v2100_v62, %v1225_v37  ;;  %v2162_v33 = vld [vmem:[#allocation2] ss:$0 sm:$0xff] }
 0x207   :  { %v1194_v56 = vmul.f32 0.2, %v1152_v47  ;;  %v1156_v57 = vadd.f32 %v1155_v45, %v1043_v48 }
 0x208   :  { %v1195_v58 = vmul.f32 0.2, %v1154_v52  ;;  %v1158_v60 = vadd.f32 %v1157_v50, %v1045_v53  ;;  %1309 = vadd.xlane.f32.xlu0 %v1308_v54  ;;  %v1311_v61 = vadd.f32 %v1269_v55, %v1268_v51 }
 0x209   :  { %v1226_v63 = vmax.f32 %v1152_v47, %v1194_v56  ;;  %v1196_v0 = vmul.f32 0.2, %v1156_v57 }
 0x20a   :  { %v1227_v2 = vmax.f32 %v1154_v52, %v1195_v58  ;;  %v1197_v3 = vmul.f32 0.2, %v1158_v60  ;;  %v1048_v4 = vpop.f32.mrb[60].mxu1  ;;  %v1161_v5 = vpop.f32.mrb[60].mxu0  ;;  %1312 = vadd.xlane.f32.xlu1 %v1311_v61 }
 0x20b   :  { %v1228_v6 = vmax.f32 %v1156_v57, %v1196_v0  ;;  %v1049_v7 = vadd.f32 %v1048_v4, %v2084_v34  ;;  %v1050_v8 = vpop.f32.mrb[61].mxu1  ;;  %v1163_v9 = vpop.f32.mrb[61].mxu0  ;;  %v1270_v10 = vmul.f32 %v2097_v59, %v1226_v63 }
 0x20c   :  { %v1229_v36 = vmax.f32 %v1158_v60, %v1197_v3  ;;  %v1051_v11 = vadd.f32 %v1050_v8, %v2087_v35  ;;  %v1052_v12 = vpop.f32.mrb[62].mxu1  ;;  %v1165_v13 = vpop.f32.mrb[62].mxu0  ;;  %v1271_v39 = vmul.f32 %v2100_v62, %v1227_v2 }
 0x20d   :  { %v1162_v14 = vadd.f32 %v1161_v5, %v1049_v7  ;;  %v1053_v15 = vadd.f32 %v1052_v12, %v2084_v34  ;;  %v1054_v16 = vpop.f32.mrb[63].mxu1  ;;  %v1167_v17 = vpop.f32.mrb[63].mxu0  ;;  %v1272_v18 = vmul.f32 %v2097_v59, %v1228_v6 }
 0x20e   :  { %v1164_v19 = vadd.f32 %v1163_v9, %v1051_v11  ;;  %v1055_v20 = vadd.f32 %v1054_v16, %v2087_v35  ;;  %v1314_v21 = vadd.f32 %v1271_v39, %v1270_v10  ;;  %v1273_v22 = vmul.f32 %v2100_v62, %v1229_v36 }
 0x20f   :  { %v1198_v1 = vmul.f32 0.2, %v1162_v14  ;;  %v1166_v23 = vadd.f32 %v1165_v13, %v1053_v15 }
 0x210   :  { %v1199_v24 = vmul.f32 0.2, %v1164_v19  ;;  %v1168_v25 = vadd.f32 %v1167_v17, %v1055_v20  ;;  %1315 = vadd.xlane.f32.xlu0 %v1314_v21  ;;  %v1317_v41 = vadd.f32 %v1273_v22, %v1272_v18 }
 0x211   :  { %v1230_v26 = vmax.f32 %v1162_v14, %v1198_v1  ;;  %v1200_v42 = vmul.f32 0.2, %v1166_v23 }
 0x212   :  { %v1231_v27 = vmax.f32 %v1164_v19, %v1199_v24  ;;  %v1201_v34 = vmul.f32 0.2, %v1168_v25  ;;  %1318 = vadd.xlane.f32.xlu1 %v1317_v41 }
 0x213   :  { %v1232_v28 = vmax.f32 %v1166_v23, %v1200_v42  ;;  %v1274_v29 = vmul.f32 %v2097_v59, %v1230_v26 }
 0x214   :  { %v1233_v30 = vmax.f32 %v1168_v25, %v1201_v34  ;;  %v1275_v35 = vmul.f32 %v2100_v62, %v1231_v27 }
 0x215   :  { %v1276_v31 = vmul.f32 %v2097_v59, %v1232_v28 }
 0x216   :  { %v1320_v43 = vadd.f32 %v1275_v35, %v1274_v29  ;;  %v1277_v32 = vmul.f32 %v2100_v62, %v1233_v30 }
 0x218   :  { %1321 = vadd.xlane.f32.xlu0 %v1320_v43  ;;  %v1323_v44 = vadd.f32 %v1277_v32, %v1276_v31 }
 0x21a   :  { %1324 = vadd.xlane.f32.xlu1 %v1323_v44 }
 0x26d   :  { %v1280_v37 = vpop.xlane.xlu0 %1279 }
 0x26e   :  { %v1333_v38 = vadd.f32 %v2162_v33, %v1280_v37 }
 0x270   :  { %v1556_v40 = vmul.f32 -1.442695, %v1333_v38 }
 0x271   :  { %v1283_v45 = vpop.xlane.xlu0 %1282 }
 0x272   :  { %1748 = vpow2.f32 %v1556_v40  ;;  %v1334_v46 = vadd.f32 %v2162_v33, %v1283_v45 }
 0x274   :  { %v1557_v47 = vmul.f32 -1.442695, %v1334_v46 }
 0x275   :  { %v1286_v48 = vpop.xlane.xlu1 %1285 }
 0x276   :  { %1750 = vpow2.f32 %v1557_v47  ;;  %v1335_v59 = vadd.f32 %v2162_v33, %v1286_v48 }
 0x278   :  { %v1558_v49 = vmul.f32 -1.442695, %v1335_v59 }
 0x279   :  { %v1289_v62 = vpop.xlane.xlu1 %1288 }
 0x27a   :  { %1752 = vpow2.f32 %v1558_v49  ;;  %v1336_v50 = vadd.f32 %v2162_v33, %v1289_v62 }
 0x27c   :  { %v1749_v51 = vpop.eup %1748  ;;  %v1559_v52 = vmul.f32 -1.442695, %v1336_v50 }
 0x27d   :  { %v1397_v53 = vadd.f32 1.0, %v1749_v51  ;;  %v1292_v54 = vpop.xlane.xlu0 %1291 }
 0x27e   :  { %1754 = vpow2.f32 %v1559_v52  ;;  %v1337_v55 = vadd.f32 %v2162_v33, %v1292_v54 }
 0x27f   :  { %1756 = vrcp.f32 %v1397_v53  ;;  %v1295_v56 = vpop.xlane.xlu1 %1294 }
 0x280   :  { %v1751_v57 = vpop.eup %1750  ;;  %v1560_v58 = vmul.f32 -1.442695, %v1337_v55  ;;  %v1338_v60 = vadd.f32 %v2162_v33, %v1295_v56 }
 0x281   :  { %v1398_v61 = vadd.f32 1.0, %v1751_v57 }
 0x282   :  { %1758 = vpow2.f32 %v1560_v58  ;;  %v1561_v63 = vmul.f32 -1.442695, %v1338_v60 }
 0x283   :  { %1760 = vrcp.f32 %v1398_v61 }
 0x284   :  { %v1753_v0 = vpop.eup %1752  ;;  %1762 = vpow2.f32 %v1561_v63 }
 0x285   :  { %v1399_v2 = vadd.f32 1.0, %v1753_v0  ;;  %v1298_v3 = vpop.xlane.xlu0 %1297 }
 0x286   :  { %v1339_v4 = vadd.f32 %v2162_v33, %v1298_v3 }
 0x287   :  { %1764 = vrcp.f32 %v1399_v2  ;;  %v1301_v5 = vpop.xlane.xlu1 %1300 }
 0x288   :  { %v1755_v6 = vpop.eup %1754  ;;  %v1562_v7 = vmul.f32 -1.442695, %v1339_v4  ;;  %v1340_v8 = vadd.f32 %v2162_v33, %v1301_v5 }
 0x289   :  { %v1757_v9 = vpop.eup %1756  ;;  %v1400_v10 = vadd.f32 1.0, %v1755_v6 }
 0x28a   :  { %1446 = vst.msk [vmem:[%s2251_s7] sm:$0xff] %vm1445_vm1, %v1757_v9  ;;  %1766 = vpow2.f32 %v1562_v7  ;;  %v1563_v36 = vmul.f32 -1.442695, %v1340_v8 }
 0x28b   :  { %1768 = vrcp.f32 %v1400_v10 }
 0x28c   :  { %v1759_v11 = vpop.eup %1758  ;;  %1770 = vpow2.f32 %v1563_v36 }
 0x28d   :  { %v1761_v12 = vpop.eup %1760  ;;  %v1401_v13 = vadd.f32 1.0, %v1759_v11  ;;  %v1304_v39 = vpop.xlane.xlu0 %1303 }
 0x28e   :  { %v1763_v14 = vpop.eup %1762  ;;  %1447 = vst.msk [vmem:[%s2251_s7 + $0x8] sm:$0xff] %vm1445_vm1, %v1761_v12  ;;  %v1341_v15 = vadd.f32 %v2162_v33, %v1304_v39 }
 0x28f   :  { %1772 = vrcp.f32 %v1401_v13  ;;  %v1402_v16 = vadd.f32 1.0, %v1763_v14  ;;  %v1307_v17 = vpop.xlane.xlu1 %1306 }
 0x290   :  { %v1564_v18 = vmul.f32 -1.442695, %v1341_v15  ;;  %v1342_v19 = vadd.f32 %v2162_v33, %v1307_v17 }
 0x291   :  { %v1765_v20 = vpop.eup %1764  ;;  %1774 = vrcp.f32 %v1402_v16 }
 0x292   :  { %1448 = vst.msk [vmem:[%s2251_s7 + $0x10] sm:$0xff] %vm1445_vm1, %v1765_v20  ;;  %1776 = vpow2.f32 %v1564_v18  ;;  %v1565_v21 = vmul.f32 -1.442695, %v1342_v19 }
 0x294   :  { %v1767_v22 = vpop.eup %1766  ;;  %1778 = vpow2.f32 %v1565_v21 }
 0x295   :  { %v1769_v1 = vpop.eup %1768  ;;  %v1403_v23 = vadd.f32 1.0, %v1767_v22  ;;  %v1310_v24 = vpop.xlane.xlu0 %1309 }
 0x296   :  { %v1771_v25 = vpop.eup %1770  ;;  %1449 = vst.msk [vmem:[%s2251_s7 + $0x18] sm:$0xff] %vm1445_vm1, %v1769_v1  ;;  %v1343_v41 = vadd.f32 %v2162_v33, %v1310_v24 }
 0x297   :  { %1780 = vrcp.f32 %v1403_v23  ;;  %v1404_v26 = vadd.f32 1.0, %v1771_v25  ;;  %v1313_v42 = vpop.xlane.xlu1 %1312 }
 0x298   :  { %v1566_v27 = vmul.f32 -1.442695, %v1343_v41  ;;  %v1344_v34 = vadd.f32 %v2162_v33, %v1313_v42 }
 0x299   :  { %v1773_v28 = vpop.eup %1772  ;;  %1782 = vrcp.f32 %v1404_v26 }
 0x29a   :  { %1450 = vst.msk [vmem:[%s2251_s7 + $0x20] sm:$0xff] %vm1445_vm1, %v1773_v28  ;;  %1784 = vpow2.f32 %v1566_v27  ;;  %v1567_v29 = vmul.f32 -1.442695, %v1344_v34 }
 0x29b   :  { %v1775_v30 = vpop.eup %1774 }
 0x29c   :  { %v1777_v35 = vpop.eup %1776  ;;  %1451 = vst.msk [vmem:[%s2251_s7 + $0x28] sm:$0xff] %vm1445_vm1, %v1775_v30  ;;  %1786 = vpow2.f32 %v1567_v29 }
 0x29d   :  { %v1405_v31 = vadd.f32 1.0, %v1777_v35  ;;  %v1316_v43 = vpop.xlane.xlu0 %1315 }
 0x29e   :  { %v1779_v32 = vpop.eup %1778  ;;  %v1345_v44 = vadd.f32 %v2162_v33, %v1316_v43 }
 0x29f   :  { %1788 = vrcp.f32 %v1405_v31  ;;  %v1406_v37 = vadd.f32 1.0, %v1779_v32  ;;  %v1319_v38 = vpop.xlane.xlu1 %1318 }
 0x2a0   :  { %v1568_v40 = vmul.f32 -1.442695, %v1345_v44  ;;  %v1346_v45 = vadd.f32 %v2162_v33, %v1319_v38 }
 0x2a1   :  { %v1781_v46 = vpop.eup %1780  ;;  %1790 = vrcp.f32 %v1406_v37 }
 0x2a2   :  { %1452 = vst.msk [vmem:[%s2251_s7 + $0x30] sm:$0xff] %vm1445_vm1, %v1781_v46  ;;  %1792 = vpow2.f32 %v1568_v40  ;;  %v1569_v47 = vmul.f32 -1.442695, %v1346_v45 }
 0x2a3   :  { %v1783_v48 = vpop.eup %1782 }
 0x2a4   :  { %v1785_v59 = vpop.eup %1784  ;;  %1453 = vst.msk [vmem:[%s2251_s7 + $0x38] sm:$0xff] %vm1445_vm1, %v1783_v48  ;;  %1794 = vpow2.f32 %v1569_v47 }
 0x2a5   :  { %v1407_v49 = vadd.f32 1.0, %v1785_v59  ;;  %v1322_v62 = vpop.xlane.xlu0 %1321 }
 0x2a6   :  { %v1787_v50 = vpop.eup %1786  ;;  %v1347_v51 = vadd.f32 %v2162_v33, %v1322_v62 }
 0x2a7   :  { %1796 = vrcp.f32 %v1407_v49  ;;  %v1408_v52 = vadd.f32 1.0, %v1787_v50  ;;  %v1325_v53 = vpop.xlane.xlu1 %1324 }
 0x2a8   :  { %v1570_v54 = vmul.f32 -1.442695, %v1347_v51  ;;  %v1348_v55 = vadd.f32 %v2162_v33, %v1325_v53 }
 0x2a9   :  { %v1789_v56 = vpop.eup %1788  ;;  %1798 = vrcp.f32 %v1408_v52 }
 0x2aa   :  { %1454 = vst.msk [vmem:[%s2251_s7 + $0x40] sm:$0xff] %vm1445_vm1, %v1789_v56  ;;  %1800 = vpow2.f32 %v1570_v54  ;;  %v1571_v57 = vmul.f32 -1.442695, %v1348_v55 }
 0x2ab   :  { %v1791_v58 = vpop.eup %1790 }
 0x2ac   :  { %v1793_v60 = vpop.eup %1792  ;;  %1455 = vst.msk [vmem:[%s2251_s7 + $0x48] sm:$0xff] %vm1445_vm1, %v1791_v58  ;;  %1802 = vpow2.f32 %v1571_v57 }
 0x2ad   :  { %v1409_v61 = vadd.f32 1.0, %v1793_v60 }
 0x2ae   :  { %v1795_v63 = vpop.eup %1794 }
 0x2af   :  { %1804 = vrcp.f32 %v1409_v61  ;;  %v1410_v33 = vadd.f32 1.0, %v1795_v63 }
 0x2b1   :  { %v1797_v0 = vpop.eup %1796  ;;  %1806 = vrcp.f32 %v1410_v33 }
 0x2b2   :  { %1456 = vst.msk [vmem:[%s2251_s7 + $0x50] sm:$0xff] %vm1445_vm1, %v1797_v0 }
 0x2b3   :  { %v1799_v2 = vpop.eup %1798 }
 0x2b4   :  { %v1801_v3 = vpop.eup %1800  ;;  %1457 = vst.msk [vmem:[%s2251_s7 + $0x58] sm:$0xff] %vm1445_vm1, %v1799_v2 }
 0x2b5   :  { %v1411_v4 = vadd.f32 1.0, %v1801_v3 }
 0x2b6   :  { %v1803_v5 = vpop.eup %1802 }
 0x2b7   :  { %1808 = vrcp.f32 %v1411_v4  ;;  %v1412_v6 = vadd.f32 1.0, %v1803_v5 }
 0x2b9   :  { %v1805_v7 = vpop.eup %1804  ;;  %1810 = vrcp.f32 %v1412_v6 }
 0x2ba   :  { %1458 = vst.msk [vmem:[%s2251_s7 + $0x60] sm:$0xff] %vm1445_vm1, %v1805_v7 }
 0x2bb   :  { %v1807_v8 = vpop.eup %1806 }
 0x2bc   :  { %1459 = vst.msk [vmem:[%s2251_s7 + $0x68] sm:$0xff] %vm1445_vm1, %v1807_v8 }
 0x2c1   :  { %v1809_v9 = vpop.eup %1808 }
 0x2c2   :  { %1460 = vst.msk [vmem:[%s2251_s7 + $0x70] sm:$0xff] %vm1445_vm1, %v1809_v9 }
 0x2c3   :  { %v1811_v10 = vpop.eup %1810 }
 0x2c4   :  { %1461 = vst.msk [vmem:[%s2251_s7 + $0x78] sm:$0xff] %vm1445_vm1, %v1811_v10 }
 0x2c5   :  { %1466 = vsyncpa [#allocation4], 1 }

</bundles_post_ra>
